<compile_context>
chip_gen: v5e
topology: v5e:2x2
jax: 0.10.0
libtpu: 0.0.40
codegen_flags: <defaults>
</compile_context>

<pallas_src>
import math

import jax
import jax.numpy as jnp
from jax.experimental import pallas as pl
from jax.experimental.pallas import tpu as pltpu


def _layernorm(x, g, b, eps=1e-5):
    mu = jnp.mean(x, axis=-1, keepdims=True)
    xc = x - mu
    var = jnp.mean(xc * xc, axis=-1, keepdims=True)
    return xc * jax.lax.rsqrt(var + eps) * g + b


# --------------------------- hardware-aware helpers --------------------------

def _device_kind():
    try:
        return jax.local_devices()[0].device_kind.lower()
    except Exception:
        return ""


def _is_v7x():
    return "v7" in _device_kind()


def _vmem_capacity_bytes():
    try:
        info = pltpu.get_tpu_info()
        v = getattr(info, "vmem_capacity_bytes", None)
        if v:
            return int(v)
    except Exception:
        pass
    # fallback: v7x has 64 MiB / TensorCore, v5e/v5p/v6e have 128 MiB.
    return 64 * 1024 * 1024 if _is_v7x() else 128 * 1024 * 1024


def _pick_block_batch(B, S, D, vmem_cap, prefer_split):
    """Pick Bt so that Bt*S ~ 2048 rows (MXU-bound) subject to a VMEM budget."""
    budget = int(0.65 * vmem_cap)
    weights_db = 52 * D * D               # ~double-buffered bf16 per-layer weights (+biases)
    per_row = 64 * D + 8 * S              # x_acc + emb/out DMA bufs + qkv/MLP/score intermediates
    max_rows = max(S, (budget - weights_db) // per_row)
    rows = min(2048, max_rows, B * S)     # >= ~640 flops/byte needed on v6e/v7x
    bt = max(1, min(B, rows // S))
    while B % bt:
        bt -= 1
    if prefer_split and B >= 2:
        # v7x: keep >= 2 batch blocks so the "parallel" axis feeds both TensorCores.
        while bt > 1 and B // bt < 2:
            bt -= 1
            while B % bt:
                bt -= 1
    return bt


# ----------------------------- fused stack kernel ---------------------------

def make_stack_kernel(d_model, n_heads, bt, seq):
    assert d_model % n_heads == 0
    dh = d_model // n_heads

    def kernel(emb_ref, pos_ref, causal_ref, padbias_ref,
               ln1_g_ref, ln1_b_ref, wqkv_ref, bqkv_ref, wo_ref, bo_ref,
               ln2_g_ref, ln2_b_ref, w1_ref, b1_ref, w2_ref, b2_ref,
               out_ref, x_acc):
        layer = pl.program_id(1)
        n_layers = pl.num_programs(1)

        # First layer step for this batch block: x = token_emb + positional_enc.
        @pl.when(layer == 0)
        def _():
            x_acc[...] = (emb_ref[...].astype(jnp.float32)
                          + pos_ref[...].astype(jnp.float32)[None, :, :])

        x = x_acc[...].reshape(bt * seq, d_model)                 # (Bt*S, D) f32

        # Additive attention mask built in-kernel: (1,S,S) + (Bt,1,S) -> (Bt,S,S)
        mask = (causal_ref[...].astype(jnp.float32)[None, :, :]
                + padbias_ref[...].astype(jnp.float32))

        # ---------------- self-attention (pre-LN) ----------------
        # NOTE: 1/sqrt(dh) is pre-folded into the Q columns of wqkv / bqkv.
        h = _layernorm(x, ln1_g_ref[0], ln1_b_ref[0])
        qkv = jnp.dot(h.astype(jnp.bfloat16), wqkv_ref[0],
                      preferred_element_type=jnp.float32) + bqkv_ref[0]   # (Bt*S, 3D)

        q_all = qkv[:, 0 * d_model:1 * d_model]
        k_all = qkv[:, 1 * d_model:2 * d_model]
        v_all = qkv[:, 2 * d_model:3 * d_model]

        # Heads batched over Bt with 3-D einsums; head outputs are concatenated
        # along the lane dim and Wo is applied with ONE full-depth (K=D) matmul.
        head_outs = []
        for hh in range(n_heads):
            lo = hh * dh
            qh = q_all[:, lo:lo + dh].reshape(bt, seq, dh).astype(jnp.bfloat16)
            kh = k_all[:, lo:lo + dh].reshape(bt, seq, dh).astype(jnp.bfloat16)
            vh = v_all[:, lo:lo + dh].reshape(bt, seq, dh).astype(jnp.bfloat16)
            s = jnp.einsum('bqd,bkd->bqk', qh, kh,
                           preferred_element_type=jnp.float32) + mask
            s = s - jnp.max(s, axis=-1, keepdims=True)
            p = jnp.exp(s)
            p = p * pl.reciprocal(jnp.sum(p, axis=-1, keepdims=True), approx=True)
            oh = jnp.einsum('bqk,bkd->bqd', p.astype(jnp.bfloat16), vh,
                            preferred_element_type=jnp.float32)          # (Bt,S,dh)
            head_outs.append(oh.astype(jnp.bfloat16))

        attn = jnp.concatenate(head_outs, axis=-1).reshape(bt * seq, d_model)
        proj = jnp.dot(attn, wo_ref[0], preferred_element_type=jnp.float32)
        x = x + proj + bo_ref[0]                                  # residual in f32

        # ---------------- MLP (pre-LN) ----------------
        h2 = _layernorm(x, ln2_g_ref[0], ln2_b_ref[0])
        m = jnp.dot(h2.astype(jnp.bfloat16), w1_ref[0],
                    preferred_element_type=jnp.float32) + b1_ref[0]
        m = jax.nn.gelu(m, approximate=True)
        m = jnp.dot(m.astype(jnp.bfloat16), w2_ref[0],
                    preferred_element_type=jnp.float32) + b2_ref[0]
        x = x + m

        x_acc[...] = x.reshape(bt, seq, d_model)

        @pl.when(layer == n_layers - 1)
        def _():
            out_ref[...] = x_acc[...].astype(out_ref.dtype)

    return kernel


# ------------------------------ JAX wrapper ---------------------------------

def text_encoder_forward(text, params, padding_mask=None, attention_mask=None,
                         *, n_heads, block_batch=None):
    # token embedding lookup (gather) is plain-JAX glue; activations stream bf16.
    emb = params['token_embedding'][text].astype(jnp.bfloat16)       # (B, S, D)
    pos = params['positional_encoding'].astype(jnp.bfloat16)         # (S, D)
    B, S, D = emb.shape
    L = params['wqkv'].shape[0]

    # shared (S,S) additive causal/attention mask
    if attention_mask is None:
        causal = jnp.zeros((S, S), jnp.float32)
    elif attention_mask.dtype == jnp.bool_:
        causal = jnp.where(attention_mask, -1e9, 0.0).astype(jnp.float32)
    else:
        causal = attention_mask.astype(jnp.float32)
    # (B,1,S) additive key-padding bias (True = ignore)
    if padding_mask is None:
        padbias = jnp.zeros((B, 1, S), jnp.float32)
    else:
        padbias = jnp.where(padding_mask, -1e9, 0.0).astype(jnp.float32)[:, None, :]

    vmem_cap = _vmem_capacity_bytes()
    is_v7 = _is_v7x()

    if block_batch is None:
        bt = _pick_block_batch(B, S, D, vmem_cap, prefer_split=is_v7)
    else:
        bt = block_batch
        assert B % bt == 0

    # ~85% of physical VMEM (<=112 MiB): ~54 MiB on v7x, ~109 MiB on v5e/v6e.
    vmem_limit = min(int(0.85 * vmem_cap), 112 * 1024 * 1024)

    kernel = make_stack_kernel(D, n_heads, bt, S)

    weight_names = ['ln1_g', 'ln1_b', 'wqkv', 'bqkv', 'wo', 'bo',
                    'ln2_g', 'ln2_b', 'w1', 'b1', 'w2', 'b2']
    w_args = [params[n] for n in weight_names]

    def wspec(p):
        return pl.BlockSpec((1,) + p.shape[1:], lambda b, l: (l, 0, 0))

    in_specs = ([pl.BlockSpec((bt, S, D), lambda b, l: (b, 0, 0)),   # emb
                 pl.BlockSpec((S, D), lambda b, l: (0, 0)),          # pos
                 pl.BlockSpec((S, S), lambda b, l: (0, 0)),          # causal mask
                 pl.BlockSpec((bt, 1, S), lambda b, l: (b, 0, 0))]   # padding bias
                + [wspec(p) for p in w_args])

    return pl.pallas_call(
        kernel,
        grid=(B // bt, L),
        in_specs=in_specs,
        out_specs=pl.BlockSpec((bt, S, D), lambda b, l: (b, 0, 0)),
        out_shape=jax.ShapeDtypeStruct((B, S, D), jnp.float32),
        scratch_shapes=[pltpu.VMEM((bt, S, D), jnp.float32)],
        compiler_params=pltpu.CompilerParams(
            dimension_semantics=("parallel", "arbitrary"),
            vmem_limit_bytes=vmem_limit),
    )(emb, pos, causal, padbias, *w_args)


def init_params(key, vocab_size, d_model, n_layers, n_heads, seq_len):
    D = d_model
    dh = D // n_heads
    scale = 1.0 / math.sqrt(dh)
    ks = jax.random.split(key, 10)

    def nrm(k, shape, s=0.02):
        return s * jax.random.normal(k, shape, jnp.float32)

    # 1/sqrt(dh) folded into the Q columns (weights AND bias) at parameter prep,
    # so the kernel never multiplies by `scale`.
    wqkv = nrm(ks[2], (n_layers, D, 3 * D))
    wqkv = wqkv.at[:, :, :D].multiply(scale)
    bqkv = nrm(ks[3], (n_layers, 1, 3 * D), 0.01)
    bqkv = bqkv.at[:, :, :D].multiply(scale)

    params = {
        'token_embedding': nrm(ks[0], (vocab_size, D)),
        'positional_encoding': nrm(ks[1], (seq_len, D), 0.01),
        # weights stored pre-transposed (in, out), stacked over layers, bf16 for MXU
        'wqkv': wqkv.astype(jnp.bfloat16),
        'bqkv': bqkv,
        'wo':   nrm(ks[4], (n_layers, D, D)).astype(jnp.bfloat16),
        'bo':   nrm(ks[5], (n_layers, 1, D), 0.01),
        'w1':   nrm(ks[6], (n_layers, D, 4 * D)).astype(jnp.bfloat16),
        'b1':   nrm(ks[7], (n_layers, 1, 4 * D), 0.01),
        'w2':   nrm(ks[8], (n_layers, 4 * D, D)).astype(jnp.bfloat16),
        'b2':   nrm(ks[9], (n_layers, 1, D), 0.01),
        'ln1_g': jnp.ones((n_layers, 1, D), jnp.float32),
        'ln1_b': jnp.zeros((n_layers, 1, D), jnp.float32),
        'ln2_g': jnp.ones((n_layers, 1, D), jnp.float32),
        'ln2_b': jnp.zeros((n_layers, 1, D), jnp.float32),
    }
    return params


if __name__ == "__main__":
    vocab_size, d_model, n_layers, n_heads, seq_len = 100, 32, 2, 4, 8
    batch = 2

    root = jax.random.PRNGKey(0)
    k_params, k_text = jax.random.split(root)
    params = init_params(k_params, vocab_size, d_model, n_layers, n_heads, seq_len)

    text = jax.random.randint(k_text, (batch, seq_len), 0, vocab_size, dtype=jnp.int32)
    # key_padding_mask: True = padded (ignored); pad last 2 tokens of batch 1
    padding_mask = jnp.zeros((batch, seq_len), jnp.bool_).at[1, 6:].set(True)
    # causal additive attention mask (float, like PyTorch float attn_mask)
    causal_bool = jnp.triu(jnp.ones((seq_len, seq_len), jnp.bool_), k=1)
    attention_mask = jnp.where(causal_bool, -1e9, 0.0).astype(jnp.float32)

    out = text_encoder_forward(text, params, padding_mask, attention_mask,
                               n_heads=n_heads)
    out = jax.block_until_ready(out)

    assert out.shape == (batch, seq_len, d_model), out.shape
    assert bool(jnp.all(jnp.isfinite(out)))
    print("KERNEL_OK")
</pallas_src>

<mosaic_0001>
module attributes {stable_mosaic.version = 11 : i64} {
  func.func @kernel(%arg0: i32, %arg1: i32, %arg2: memref<2x8x32xbf16, #tpu.memory_space<vmem>>, %arg3: memref<8x32xbf16, #tpu.memory_space<vmem>>, %arg4: memref<8x8xf32, #tpu.memory_space<vmem>>, %arg5: memref<2x1x8xf32, #tpu.memory_space<vmem>>, %arg6: memref<1x1x32xf32, #tpu.memory_space<vmem>>, %arg7: memref<1x1x32xf32, #tpu.memory_space<vmem>>, %arg8: memref<1x32x96xbf16, #tpu.memory_space<vmem>>, %arg9: memref<1x1x96xf32, #tpu.memory_space<vmem>>, %arg10: memref<1x32x32xbf16, #tpu.memory_space<vmem>>, %arg11: memref<1x1x32xf32, #tpu.memory_space<vmem>>, %arg12: memref<1x1x32xf32, #tpu.memory_space<vmem>>, %arg13: memref<1x1x32xf32, #tpu.memory_space<vmem>>, %arg14: memref<1x32x128xbf16, #tpu.memory_space<vmem>>, %arg15: memref<1x1x128xf32, #tpu.memory_space<vmem>>, %arg16: memref<1x128x32xbf16, #tpu.memory_space<vmem>>, %arg17: memref<1x1x32xf32, #tpu.memory_space<vmem>>, %arg18: memref<2x8x32xf32, #tpu.memory_space<vmem>>, %arg19: memref<2x8x32xf32, #tpu.memory_space<vmem>>) attributes {dimension_semantics = [#tpu.dimension_semantics<parallel>, #tpu.dimension_semantics<arbitrary>], iteration_bounds = array<i64: 1, 2>, scalar_prefetch = 0 : i64, scratch_operands = 1 : i64, tpu.core_type = #tpu.core_type<tc>, window_params = [{transform_indices = @transform_0, window_bounds = array<i64: 2, 8, 32>}, {pipeline_mode = #tpu.pipeline_mode<synchronous>, transform_indices = @transform_1, window_bounds = array<i64: 8, 32>}, {pipeline_mode = #tpu.pipeline_mode<synchronous>, transform_indices = @transform_2, window_bounds = array<i64: 8, 8>}, {transform_indices = @transform_3, window_bounds = array<i64: 2, 1, 8>}, {transform_indices = @transform_4, window_bounds = array<i64: 1, 1, 32>}, {transform_indices = @transform_5, window_bounds = array<i64: 1, 1, 32>}, {transform_indices = @transform_6, window_bounds = array<i64: 1, 32, 96>}, {transform_indices = @transform_7, window_bounds = array<i64: 1, 1, 96>}, {transform_indices = @transform_8, window_bounds = array<i64: 1, 32, 32>}, {transform_indices = @transform_9, window_bounds = array<i64: 1, 1, 32>}, {transform_indices = @transform_10, window_bounds = array<i64: 1, 1, 32>}, {transform_indices = @transform_11, window_bounds = array<i64: 1, 1, 32>}, {transform_indices = @transform_12, window_bounds = array<i64: 1, 32, 128>}, {transform_indices = @transform_13, window_bounds = array<i64: 1, 1, 128>}, {transform_indices = @transform_14, window_bounds = array<i64: 1, 128, 32>}, {transform_indices = @transform_15, window_bounds = array<i64: 1, 1, 32>}, {transform_indices = @transform_16, window_bounds = array<i64: 2, 8, 32>}]} {
    %c0_i32 = arith.constant 0 : i32
    %0 = arith.cmpi eq, %arg1, %c0_i32 : i32
    %1 = arith.extui %0 : i1 to i32
    %c0_i32_0 = arith.constant 0 : i32
    %2 = arith.cmpi ne, %1, %c0_i32_0 : i32
    scf.if %2 {
      %c0_81 = arith.constant 0 : index
      %c0_82 = arith.constant 0 : index
      %c0_83 = arith.constant 0 : index
      %211 = vector.load %arg2[%c0_81, %c0_82, %c0_83] : memref<2x8x32xbf16, #tpu.memory_space<vmem>>, vector<2x8x32xbf16>
      %212 = arith.extf %211 : vector<2x8x32xbf16> to vector<2x8x32xf32>
      %c0_84 = arith.constant 0 : index
      %c0_85 = arith.constant 0 : index
      %213 = vector.load %arg3[%c0_84, %c0_85] : memref<8x32xbf16, #tpu.memory_space<vmem>>, vector<8x32xbf16>
      %214 = arith.extf %213 : vector<8x32xbf16> to vector<8x32xf32>
      %215 = vector.shape_cast %214 : vector<8x32xf32> to vector<1x8x32xf32>
      %216 = vector.broadcast %215 : vector<1x8x32xf32> to vector<2x8x32xf32>
      %217 = arith.addf %212, %216 : vector<2x8x32xf32>
      %c0_86 = arith.constant 0 : index
      %c0_87 = arith.constant 0 : index
      %c0_88 = arith.constant 0 : index
      %218 = vector.load %arg19[%c0_86, %c0_87, %c0_88] : memref<2x8x32xf32, #tpu.memory_space<vmem>>, vector<2x8x32xf32>
      tpu.vector_store %arg19[%c0_86, %c0_87, %c0_88], %217 {strides = array<i32>} : memref<2x8x32xf32, #tpu.memory_space<vmem>>, vector<2x8x32xf32>,
    } else {
    }
    %c0 = arith.constant 0 : index
    %c0_1 = arith.constant 0 : index
    %c0_2 = arith.constant 0 : index
    %3 = vector.load %arg19[%c0, %c0_1, %c0_2] : memref<2x8x32xf32, #tpu.memory_space<vmem>>, vector<2x8x32xf32>
    %4 = vector.shape_cast %3 : vector<2x8x32xf32> to vector<16x32xf32>
    %c0_3 = arith.constant 0 : index
    %c0_4 = arith.constant 0 : index
    %5 = vector.load %arg4[%c0_3, %c0_4] : memref<8x8xf32, #tpu.memory_space<vmem>>, vector<8x8xf32>
    %6 = vector.shape_cast %5 : vector<8x8xf32> to vector<1x8x8xf32>
    %c0_5 = arith.constant 0 : index
    %c0_6 = arith.constant 0 : index
    %c0_7 = arith.constant 0 : index
    %7 = vector.load %arg5[%c0_5, %c0_6, %c0_7] : memref<2x1x8xf32, #tpu.memory_space<vmem>>, vector<2x1x8xf32>
    %8 = vector.broadcast %6 : vector<1x8x8xf32> to vector<2x8x8xf32>
    %9 = vector.broadcast %7 : vector<2x1x8xf32> to vector<2x8x8xf32>
    %10 = arith.addf %8, %9 : vector<2x8x8xf32>
    %c0_8 = arith.constant 0 : index
    %c0_9 = arith.constant 0 : index
    %c0_10 = arith.constant 0 : index
    %11 = vector.load %arg6[%c0_8, %c0_9, %c0_10] : memref<1x1x32xf32, #tpu.memory_space<vmem>>, vector<1x1x32xf32>
    %12 = vector.shape_cast %11 : vector<1x1x32xf32> to vector<1x32xf32>
    %c0_11 = arith.constant 0 : index
    %c0_12 = arith.constant 0 : index
    %c0_13 = arith.constant 0 : index
    %13 = vector.load %arg7[%c0_11, %c0_12, %c0_13] : memref<1x1x32xf32, #tpu.memory_space<vmem>>, vector<1x1x32xf32>
    %14 = vector.shape_cast %13 : vector<1x1x32xf32> to vector<1x32xf32>
    %cst = arith.constant dense<0.000000e+00> : vector<16xf32>
    %15 = vector.multi_reduction <add>, %4, %cst [1] : vector<16x32xf32> to vector<16xf32>
    %16 = vector.shape_cast %15 : vector<16xf32> to vector<16x1xf32>
    %cst_14 = arith.constant 3.200000e+01 : f32
    %17 = vector.broadcast %cst_14 : f32 to vector<16x1xf32>
    %18 = arith.divf %16, %17 : vector<16x1xf32>
    %19 = vector.broadcast %18 : vector<16x1xf32> to vector<16x32xf32>
    %20 = arith.subf %4, %19 : vector<16x32xf32>
    %21 = arith.mulf %20, %20 : vector<16x32xf32>
    %cst_15 = arith.constant dense<0.000000e+00> : vector<16xf32>
    %22 = vector.multi_reduction <add>, %21, %cst_15 [1] : vector<16x32xf32> to vector<16xf32>
    %23 = vector.shape_cast %22 : vector<16xf32> to vector<16x1xf32>
    %cst_16 = arith.constant 3.200000e+01 : f32
    %24 = vector.broadcast %cst_16 : f32 to vector<16x1xf32>
    %25 = arith.divf %23, %24 : vector<16x1xf32>
    %cst_17 = arith.constant 9.99999974E-6 : f32
    %26 = vector.broadcast %cst_17 : f32 to vector<16x1xf32>
    %27 = arith.addf %25, %26 : vector<16x1xf32>
    %28 = math.rsqrt %27 : vector<16x1xf32>
    %29 = vector.broadcast %28 : vector<16x1xf32> to vector<16x32xf32>
    %30 = arith.mulf %20, %29 : vector<16x32xf32>
    %31 = vector.broadcast %12 : vector<1x32xf32> to vector<16x32xf32>
    %32 = arith.mulf %30, %31 : vector<16x32xf32>
    %33 = vector.broadcast %14 : vector<1x32xf32> to vector<16x32xf32>
    %34 = arith.addf %32, %33 : vector<16x32xf32>
    %35 = arith.truncf %34 : vector<16x32xf32> to vector<16x32xbf16>
    %c0_18 = arith.constant 0 : index
    %c0_19 = arith.constant 0 : index
    %c0_20 = arith.constant 0 : index
    %36 = vector.load %arg8[%c0_18, %c0_19, %c0_20] : memref<1x32x96xbf16, #tpu.memory_space<vmem>>, vector<1x32x96xbf16>
    %37 = vector.shape_cast %36 : vector<1x32x96xbf16> to vector<32x96xbf16>
    %cst_21 = arith.constant dense<0.000000e+00> : vector<16x96xf32>
    %38 = tpu.matmul %35, %37, %cst_21 {dimension_numbers = #tpu.dot_dimension_numbers<[1], [0], [0], [1], [0, 0, 1, 1], [], []>} : vector<16x32xbf16>, vector<32x96xbf16>, vector<16x96xf32> -> vector<16x96xf32>
    %c0_22 = arith.constant 0 : index
    %c0_23 = arith.constant 0 : index
    %c0_24 = arith.constant 0 : index
    %39 = vector.load %arg9[%c0_22, %c0_23, %c0_24] : memref<1x1x96xf32, #tpu.memory_space<vmem>>, vector<1x1x96xf32>
    %40 = vector.shape_cast %39 : vector<1x1x96xf32> to vector<1x96xf32>
    %41 = vector.broadcast %40 : vector<1x96xf32> to vector<16x96xf32>
    %42 = arith.addf %38, %41 : vector<16x96xf32>
    %43 = vector.extract_strided_slice %42 {offsets = [0, 0], sizes = [16, 32], strides = [1, 1]} : vector<16x96xf32> to vector<16x32xf32>
    %44 = vector.extract_strided_slice %42 {offsets = [0, 32], sizes = [16, 32], strides = [1, 1]} : vector<16x96xf32> to vector<16x32xf32>
    %45 = vector.extract_strided_slice %42 {offsets = [0, 64], sizes = [16, 32], strides = [1, 1]} : vector<16x96xf32> to vector<16x32xf32>
    %46 = vector.extract_strided_slice %43 {offsets = [0, 0], sizes = [16, 8], strides = [1, 1]} : vector<16x32xf32> to vector<16x8xf32>
    %47 = vector.shape_cast %46 : vector<16x8xf32> to vector<2x8x8xf32>
    %48 = arith.truncf %47 : vector<2x8x8xf32> to vector<2x8x8xbf16>
    %49 = vector.extract_strided_slice %44 {offsets = [0, 0], sizes = [16, 8], strides = [1, 1]} : vector<16x32xf32> to vector<16x8xf32>
    %50 = vector.shape_cast %49 : vector<16x8xf32> to vector<2x8x8xf32>
    %51 = arith.truncf %50 : vector<2x8x8xf32> to vector<2x8x8xbf16>
    %52 = vector.extract_strided_slice %45 {offsets = [0, 0], sizes = [16, 8], strides = [1, 1]} : vector<16x32xf32> to vector<16x8xf32>
    %53 = vector.shape_cast %52 : vector<16x8xf32> to vector<2x8x8xf32>
    %54 = arith.truncf %53 : vector<2x8x8xf32> to vector<2x8x8xbf16>
    "tpu.trace_start"() <{level = 10 : i32, message = "bqd,bkd->bqk"}> : () -> ()
    %cst_25 = arith.constant dense<0.000000e+00> : vector<2x8x8xf32>
    %55 = tpu.matmul %48, %51, %cst_25 {dimension_numbers = #tpu.dot_dimension_numbers<[2], [2], [1], [1], [0, 0, 0, 1, 1, 1], [0], [0]>} : vector<2x8x8xbf16>, vector<2x8x8xbf16>, vector<2x8x8xf32> -> vector<2x8x8xf32>
    "tpu.trace_stop"() : () -> ()
    %56 = arith.addf %55, %10 : vector<2x8x8xf32>
    %cst_26 = arith.constant dense<0xFF800000> : vector<2x8xf32>
    %57 = vector.multi_reduction <maximumf>, %56, %cst_26 [2] : vector<2x8x8xf32> to vector<2x8xf32>
    %58 = vector.shape_cast %57 : vector<2x8xf32> to vector<2x8x1xf32>
    %59 = vector.broadcast %58 : vector<2x8x1xf32> to vector<2x8x8xf32>
    %60 = arith.subf %56, %59 : vector<2x8x8xf32>
    %61 = math.exp %60 : vector<2x8x8xf32>
    %cst_27 = arith.constant dense<0.000000e+00> : vector<2x8xf32>
    %62 = vector.multi_reduction <add>, %61, %cst_27 [2] : vector<2x8x8xf32> to vector<2x8xf32>
    %63 = vector.shape_cast %62 : vector<2x8xf32> to vector<2x8x1xf32>
    %64 = tpu.reciprocal %63 {approx = true} : vector<2x8x1xf32> -> vector<2x8x1xf32>
    %65 = vector.broadcast %64 : vector<2x8x1xf32> to vector<2x8x8xf32>
    %66 = arith.mulf %61, %65 : vector<2x8x8xf32>
    %67 = arith.truncf %66 : vector<2x8x8xf32> to vector<2x8x8xbf16>
    "tpu.trace_start"() <{level = 10 : i32, message = "bqk,bkd->bqd"}> : () -> ()
    %cst_28 = arith.constant dense<0.000000e+00> : vector<2x8x8xf32>
    %68 = tpu.matmul %67, %54, %cst_28 {dimension_numbers = #tpu.dot_dimension_numbers<[2], [1], [1], [2], [0, 0, 0, 1, 1, 2], [0], [0]>} : vector<2x8x8xbf16>, vector<2x8x8xbf16>, vector<2x8x8xf32> -> vector<2x8x8xf32>
    "tpu.trace_stop"() : () -> ()
    %69 = arith.truncf %68 : vector<2x8x8xf32> to vector<2x8x8xbf16>
    %70 = vector.extract_strided_slice %43 {offsets = [0, 8], sizes = [16, 8], strides = [1, 1]} : vector<16x32xf32> to vector<16x8xf32>
    %71 = vector.shape_cast %70 : vector<16x8xf32> to vector<2x8x8xf32>
    %72 = arith.truncf %71 : vector<2x8x8xf32> to vector<2x8x8xbf16>
    %73 = vector.extract_strided_slice %44 {offsets = [0, 8], sizes = [16, 8], strides = [1, 1]} : vector<16x32xf32> to vector<16x8xf32>
    %74 = vector.shape_cast %73 : vector<16x8xf32> to vector<2x8x8xf32>
    %75 = arith.truncf %74 : vector<2x8x8xf32> to vector<2x8x8xbf16>
    %76 = vector.extract_strided_slice %45 {offsets = [0, 8], sizes = [16, 8], strides = [1, 1]} : vector<16x32xf32> to vector<16x8xf32>
    %77 = vector.shape_cast %76 : vector<16x8xf32> to vector<2x8x8xf32>
    %78 = arith.truncf %77 : vector<2x8x8xf32> to vector<2x8x8xbf16>
    "tpu.trace_start"() <{level = 10 : i32, message = "bqd,bkd->bqk"}> : () -> ()
    %cst_29 = arith.constant dense<0.000000e+00> : vector<2x8x8xf32>
    %79 = tpu.matmul %72, %75, %cst_29 {dimension_numbers = #tpu.dot_dimension_numbers<[2], [2], [1], [1], [0, 0, 0, 1, 1, 1], [0], [0]>} : vector<2x8x8xbf16>, vector<2x8x8xbf16>, vector<2x8x8xf32> -> vector<2x8x8xf32>
    "tpu.trace_stop"() : () -> ()
    %80 = arith.addf %79, %10 : vector<2x8x8xf32>
    %cst_30 = arith.constant dense<0xFF800000> : vector<2x8xf32>
    %81 = vector.multi_reduction <maximumf>, %80, %cst_30 [2] : vector<2x8x8xf32> to vector<2x8xf32>
    %82 = vector.shape_cast %81 : vector<2x8xf32> to vector<2x8x1xf32>
    %83 = vector.broadcast %82 : vector<2x8x1xf32> to vector<2x8x8xf32>
    %84 = arith.subf %80, %83 : vector<2x8x8xf32>
    %85 = math.exp %84 : vector<2x8x8xf32>
    %cst_31 = arith.constant dense<0.000000e+00> : vector<2x8xf32>
    %86 = vector.multi_reduction <add>, %85, %cst_31 [2] : vector<2x8x8xf32> to vector<2x8xf32>
    %87 = vector.shape_cast %86 : vector<2x8xf32> to vector<2x8x1xf32>
    %88 = tpu.reciprocal %87 {approx = true} : vector<2x8x1xf32> -> vector<2x8x1xf32>
    %89 = vector.broadcast %88 : vector<2x8x1xf32> to vector<2x8x8xf32>
    %90 = arith.mulf %85, %89 : vector<2x8x8xf32>
    %91 = arith.truncf %90 : vector<2x8x8xf32> to vector<2x8x8xbf16>
    "tpu.trace_start"() <{level = 10 : i32, message = "bqk,bkd->bqd"}> : () -> ()
    %cst_32 = arith.constant dense<0.000000e+00> : vector<2x8x8xf32>
    %92 = tpu.matmul %91, %78, %cst_32 {dimension_numbers = #tpu.dot_dimension_numbers<[2], [1], [1], [2], [0, 0, 0, 1, 1, 2], [0], [0]>} : vector<2x8x8xbf16>, vector<2x8x8xbf16>, vector<2x8x8xf32> -> vector<2x8x8xf32>
    "tpu.trace_stop"() : () -> ()
    %93 = arith.truncf %92 : vector<2x8x8xf32> to vector<2x8x8xbf16>
    %94 = vector.extract_strided_slice %43 {offsets = [0, 16], sizes = [16, 8], strides = [1, 1]} : vector<16x32xf32> to vector<16x8xf32>
    %95 = vector.shape_cast %94 : vector<16x8xf32> to vector<2x8x8xf32>
    %96 = arith.truncf %95 : vector<2x8x8xf32> to vector<2x8x8xbf16>
    %97 = vector.extract_strided_slice %44 {offsets = [0, 16], sizes = [16, 8], strides = [1, 1]} : vector<16x32xf32> to vector<16x8xf32>
    %98 = vector.shape_cast %97 : vector<16x8xf32> to vector<2x8x8xf32>
    %99 = arith.truncf %98 : vector<2x8x8xf32> to vector<2x8x8xbf16>
    %100 = vector.extract_strided_slice %45 {offsets = [0, 16], sizes = [16, 8], strides = [1, 1]} : vector<16x32xf32> to vector<16x8xf32>
    %101 = vector.shape_cast %100 : vector<16x8xf32> to vector<2x8x8xf32>
    %102 = arith.truncf %101 : vector<2x8x8xf32> to vector<2x8x8xbf16>
    "tpu.trace_start"() <{level = 10 : i32, message = "bqd,bkd->bqk"}> : () -> ()
    %cst_33 = arith.constant dense<0.000000e+00> : vector<2x8x8xf32>
    %103 = tpu.matmul %96, %99, %cst_33 {dimension_numbers = #tpu.dot_dimension_numbers<[2], [2], [1], [1], [0, 0, 0, 1, 1, 1], [0], [0]>} : vector<2x8x8xbf16>, vector<2x8x8xbf16>, vector<2x8x8xf32> -> vector<2x8x8xf32>
    "tpu.trace_stop"() : () -> ()
    %104 = arith.addf %103, %10 : vector<2x8x8xf32>
    %cst_34 = arith.constant dense<0xFF800000> : vector<2x8xf32>
    %105 = vector.multi_reduction <maximumf>, %104, %cst_34 [2] : vector<2x8x8xf32> to vector<2x8xf32>
    %106 = vector.shape_cast %105 : vector<2x8xf32> to vector<2x8x1xf32>
    %107 = vector.broadcast %106 : vector<2x8x1xf32> to vector<2x8x8xf32>
    %108 = arith.subf %104, %107 : vector<2x8x8xf32>
    %109 = math.exp %108 : vector<2x8x8xf32>
    %cst_35 = arith.constant dense<0.000000e+00> : vector<2x8xf32>
    %110 = vector.multi_reduction <add>, %109, %cst_35 [2] : vector<2x8x8xf32> to vector<2x8xf32>
    %111 = vector.shape_cast %110 : vector<2x8xf32> to vector<2x8x1xf32>
    %112 = tpu.reciprocal %111 {approx = true} : vector<2x8x1xf32> -> vector<2x8x1xf32>
    %113 = vector.broadcast %112 : vector<2x8x1xf32> to vector<2x8x8xf32>
    %114 = arith.mulf %109, %113 : vector<2x8x8xf32>
    %115 = arith.truncf %114 : vector<2x8x8xf32> to vector<2x8x8xbf16>
    "tpu.trace_start"() <{level = 10 : i32, message = "bqk,bkd->bqd"}> : () -> ()
    %cst_36 = arith.constant dense<0.000000e+00> : vector<2x8x8xf32>
    %116 = tpu.matmul %115, %102, %cst_36 {dimension_numbers = #tpu.dot_dimension_numbers<[2], [1], [1], [2], [0, 0, 0, 1, 1, 2], [0], [0]>} : vector<2x8x8xbf16>, vector<2x8x8xbf16>, vector<2x8x8xf32> -> vector<2x8x8xf32>
    "tpu.trace_stop"() : () -> ()
    %117 = arith.truncf %116 : vector<2x8x8xf32> to vector<2x8x8xbf16>
    %118 = vector.extract_strided_slice %43 {offsets = [0, 24], sizes = [16, 8], strides = [1, 1]} : vector<16x32xf32> to vector<16x8xf32>
    %119 = vector.shape_cast %118 : vector<16x8xf32> to vector<2x8x8xf32>
    %120 = arith.truncf %119 : vector<2x8x8xf32> to vector<2x8x8xbf16>
    %121 = vector.extract_strided_slice %44 {offsets = [0, 24], sizes = [16, 8], strides = [1, 1]} : vector<16x32xf32> to vector<16x8xf32>
    %122 = vector.shape_cast %121 : vector<16x8xf32> to vector<2x8x8xf32>
    %123 = arith.truncf %122 : vector<2x8x8xf32> to vector<2x8x8xbf16>
    %124 = vector.extract_strided_slice %45 {offsets = [0, 24], sizes = [16, 8], strides = [1, 1]} : vector<16x32xf32> to vector<16x8xf32>
    %125 = vector.shape_cast %124 : vector<16x8xf32> to vector<2x8x8xf32>
    %126 = arith.truncf %125 : vector<2x8x8xf32> to vector<2x8x8xbf16>
    "tpu.trace_start"() <{level = 10 : i32, message = "bqd,bkd->bqk"}> : () -> ()
    %cst_37 = arith.constant dense<0.000000e+00> : vector<2x8x8xf32>
    %127 = tpu.matmul %120, %123, %cst_37 {dimension_numbers = #tpu.dot_dimension_numbers<[2], [2], [1], [1], [0, 0, 0, 1, 1, 1], [0], [0]>} : vector<2x8x8xbf16>, vector<2x8x8xbf16>, vector<2x8x8xf32> -> vector<2x8x8xf32>
    "tpu.trace_stop"() : () -> ()
    %128 = arith.addf %127, %10 : vector<2x8x8xf32>
    %cst_38 = arith.constant dense<0xFF800000> : vector<2x8xf32>
    %129 = vector.multi_reduction <maximumf>, %128, %cst_38 [2] : vector<2x8x8xf32> to vector<2x8xf32>
    %130 = vector.shape_cast %129 : vector<2x8xf32> to vector<2x8x1xf32>
    %131 = vector.broadcast %130 : vector<2x8x1xf32> to vector<2x8x8xf32>
    %132 = arith.subf %128, %131 : vector<2x8x8xf32>
    %133 = math.exp %132 : vector<2x8x8xf32>
    %cst_39 = arith.constant dense<0.000000e+00> : vector<2x8xf32>
    %134 = vector.multi_reduction <add>, %133, %cst_39 [2] : vector<2x8x8xf32> to vector<2x8xf32>
    %135 = vector.shape_cast %134 : vector<2x8xf32> to vector<2x8x1xf32>
    %136 = tpu.reciprocal %135 {approx = true} : vector<2x8x1xf32> -> vector<2x8x1xf32>
    %137 = vector.broadcast %136 : vector<2x8x1xf32> to vector<2x8x8xf32>
    %138 = arith.mulf %133, %137 : vector<2x8x8xf32>
    %139 = arith.truncf %138 : vector<2x8x8xf32> to vector<2x8x8xbf16>
    "tpu.trace_start"() <{level = 10 : i32, message = "bqk,bkd->bqd"}> : () -> ()
    %cst_40 = arith.constant dense<0.000000e+00> : vector<2x8x8xf32>
    %140 = tpu.matmul %139, %126, %cst_40 {dimension_numbers = #tpu.dot_dimension_numbers<[2], [1], [1], [2], [0, 0, 0, 1, 1, 2], [0], [0]>} : vector<2x8x8xbf16>, vector<2x8x8xbf16>, vector<2x8x8xf32> -> vector<2x8x8xf32>
    "tpu.trace_stop"() : () -> ()
    %141 = arith.truncf %140 : vector<2x8x8xf32> to vector<2x8x8xbf16>
    %142 = tpu.concatenate %69, %93, %117, %141 in 2 : vector<2x8x8xbf16>, vector<2x8x8xbf16>, vector<2x8x8xbf16>, vector<2x8x8xbf16> -> vector<2x8x32xbf16>
    %143 = vector.shape_cast %142 : vector<2x8x32xbf16> to vector<16x32xbf16>
    %c0_41 = arith.constant 0 : index
    %c0_42 = arith.constant 0 : index
    %c0_43 = arith.constant 0 : index
    %144 = vector.load %arg10[%c0_41, %c0_42, %c0_43] : memref<1x32x32xbf16, #tpu.memory_space<vmem>>, vector<1x32x32xbf16>
    %145 = vector.shape_cast %144 : vector<1x32x32xbf16> to vector<32x32xbf16>
    %cst_44 = arith.constant dense<0.000000e+00> : vector<16x32xf32>
    %146 = tpu.matmul %143, %145, %cst_44 {dimension_numbers = #tpu.dot_dimension_numbers<[1], [0], [0], [1], [0, 0, 1, 1], [], []>} : vector<16x32xbf16>, vector<32x32xbf16>, vector<16x32xf32> -> vector<16x32xf32>
    %147 = arith.addf %4, %146 : vector<16x32xf32>
    %c0_45 = arith.constant 0 : index
    %c0_46 = arith.constant 0 : index
    %c0_47 = arith.constant 0 : index
    %148 = vector.load %arg11[%c0_45, %c0_46, %c0_47] : memref<1x1x32xf32, #tpu.memory_space<vmem>>, vector<1x1x32xf32>
    %149 = vector.shape_cast %148 : vector<1x1x32xf32> to vector<1x32xf32>
    %150 = vector.broadcast %149 : vector<1x32xf32> to vector<16x32xf32>
    %151 = arith.addf %147, %150 : vector<16x32xf32>
    %c0_48 = arith.constant 0 : index
    %c0_49 = arith.constant 0 : index
    %c0_50 = arith.constant 0 : index
    %152 = vector.load %arg12[%c0_48, %c0_49, %c0_50] : memref<1x1x32xf32, #tpu.memory_space<vmem>>, vector<1x1x32xf32>
    %153 = vector.shape_cast %152 : vector<1x1x32xf32> to vector<1x32xf32>
    %c0_51 = arith.constant 0 : index
    %c0_52 = arith.constant 0 : index
    %c0_53 = arith.constant 0 : index
    %154 = vector.load %arg13[%c0_51, %c0_52, %c0_53] : memref<1x1x32xf32, #tpu.memory_space<vmem>>, vector<1x1x32xf32>
    %155 = vector.shape_cast %154 : vector<1x1x32xf32> to vector<1x32xf32>
    %cst_54 = arith.constant dense<0.000000e+00> : vector<16xf32>
    %156 = vector.multi_reduction <add>, %151, %cst_54 [1] : vector<16x32xf32> to vector<16xf32>
    %157 = vector.shape_cast %156 : vector<16xf32> to vector<16x1xf32>
    %cst_55 = arith.constant 3.200000e+01 : f32
    %158 = vector.broadcast %cst_55 : f32 to vector<16x1xf32>
    %159 = arith.divf %157, %158 : vector<16x1xf32>
    %160 = vector.broadcast %159 : vector<16x1xf32> to vector<16x32xf32>
    %161 = arith.subf %151, %160 : vector<16x32xf32>
    %162 = arith.mulf %161, %161 : vector<16x32xf32>
    %cst_56 = arith.constant dense<0.000000e+00> : vector<16xf32>
    %163 = vector.multi_reduction <add>, %162, %cst_56 [1] : vector<16x32xf32> to vector<16xf32>
    %164 = vector.shape_cast %163 : vector<16xf32> to vector<16x1xf32>
    %cst_57 = arith.constant 3.200000e+01 : f32
    %165 = vector.broadcast %cst_57 : f32 to vector<16x1xf32>
    %166 = arith.divf %164, %165 : vector<16x1xf32>
    %cst_58 = arith.constant 9.99999974E-6 : f32
    %167 = vector.broadcast %cst_58 : f32 to vector<16x1xf32>
    %168 = arith.addf %166, %167 : vector<16x1xf32>
    %169 = math.rsqrt %168 : vector<16x1xf32>
    %170 = vector.broadcast %169 : vector<16x1xf32> to vector<16x32xf32>
    %171 = arith.mulf %161, %170 : vector<16x32xf32>
    %172 = vector.broadcast %153 : vector<1x32xf32> to vector<16x32xf32>
    %173 = arith.mulf %171, %172 : vector<16x32xf32>
    %174 = vector.broadcast %155 : vector<1x32xf32> to vector<16x32xf32>
    %175 = arith.addf %173, %174 : vector<16x32xf32>
    %176 = arith.truncf %175 : vector<16x32xf32> to vector<16x32xbf16>
    %c0_59 = arith.constant 0 : index
    %c0_60 = arith.constant 0 : index
    %c0_61 = arith.constant 0 : index
    %177 = vector.load %arg14[%c0_59, %c0_60, %c0_61] : memref<1x32x128xbf16, #tpu.memory_space<vmem>>, vector<1x32x128xbf16>
    %178 = vector.shape_cast %177 : vector<1x32x128xbf16> to vector<32x128xbf16>
    %cst_62 = arith.constant dense<0.000000e+00> : vector<16x128xf32>
    %179 = tpu.matmul %176, %178, %cst_62 {dimension_numbers = #tpu.dot_dimension_numbers<[1], [0], [0], [1], [0, 0, 1, 1], [], []>} : vector<16x32xbf16>, vector<32x128xbf16>, vector<16x128xf32> -> vector<16x128xf32>
    %c0_63 = arith.constant 0 : index
    %c0_64 = arith.constant 0 : index
    %c0_65 = arith.constant 0 : index
    %180 = vector.load %arg15[%c0_63, %c0_64, %c0_65] : memref<1x1x128xf32, #tpu.memory_space<vmem>>, vector<1x1x128xf32>
    %181 = vector.shape_cast %180 : vector<1x1x128xf32> to vector<1x128xf32>
    %182 = vector.broadcast %181 : vector<1x128xf32> to vector<16x128xf32>
    %183 = arith.addf %179, %182 : vector<16x128xf32>
    %184 = arith.mulf %183, %183 : vector<16x128xf32>
    %185 = arith.mulf %183, %184 : vector<16x128xf32>
    %cst_66 = arith.constant 4.471500e-02 : f32
    %186 = vector.broadcast %cst_66 : f32 to vector<16x128xf32>
    %187 = arith.mulf %186, %185 : vector<16x128xf32>
    %188 = arith.addf %183, %187 : vector<16x128xf32>
    %cst_67 = arith.constant 0.797884583 : f32
    %189 = vector.broadcast %cst_67 : f32 to vector<16x128xf32>
    %190 = arith.mulf %189, %188 : vector<16x128xf32>
    %191 = math.tanh %190 : vector<16x128xf32>
    %cst_68 = arith.constant 1.000000e+00 : f32
    %192 = vector.broadcast %cst_68 : f32 to vector<16x128xf32>
    %193 = arith.addf %192, %191 : vector<16x128xf32>
    %cst_69 = arith.constant 5.000000e-01 : f32
    %194 = vector.broadcast %cst_69 : f32 to vector<16x128xf32>
    %195 = arith.mulf %194, %193 : vector<16x128xf32>
    %196 = arith.mulf %183, %195 : vector<16x128xf32>
    %197 = arith.truncf %196 : vector<16x128xf32> to vector<16x128xbf16>
    %c0_70 = arith.constant 0 : index
    %c0_71 = arith.constant 0 : index
    %c0_72 = arith.constant 0 : index
    %198 = vector.load %arg16[%c0_70, %c0_71, %c0_72] : memref<1x128x32xbf16, #tpu.memory_space<vmem>>, vector<1x128x32xbf16>
    %199 = vector.shape_cast %198 : vector<1x128x32xbf16> to vector<128x32xbf16>
    %cst_73 = arith.constant dense<0.000000e+00> : vector<16x32xf32>
    %200 = tpu.matmul %197, %199, %cst_73 {dimension_numbers = #tpu.dot_dimension_numbers<[1], [0], [0], [1], [0, 0, 1, 1], [], []>} : vector<16x128xbf16>, vector<128x32xbf16>, vector<16x32xf32> -> vector<16x32xf32>
    %c0_74 = arith.constant 0 : index
    %c0_75 = arith.constant 0 : index
    %c0_76 = arith.constant 0 : index
    %201 = vector.load %arg17[%c0_74, %c0_75, %c0_76] : memref<1x1x32xf32, #tpu.memory_space<vmem>>, vector<1x1x32xf32>
    %202 = vector.shape_cast %201 : vector<1x1x32xf32> to vector<1x32xf32>
    %203 = vector.broadcast %202 : vector<1x32xf32> to vector<16x32xf32>
    %204 = arith.addf %200, %203 : vector<16x32xf32>
    %205 = arith.addf %151, %204 : vector<16x32xf32>
    %206 = vector.shape_cast %205 : vector<16x32xf32> to vector<2x8x32xf32>
    %c0_77 = arith.constant 0 : index
    %c0_78 = arith.constant 0 : index
    %c0_79 = arith.constant 0 : index
    %207 = vector.load %arg19[%c0_77, %c0_78, %c0_79] : memref<2x8x32xf32, #tpu.memory_space<vmem>>, vector<2x8x32xf32>
    tpu.vector_store %arg19[%c0_77, %c0_78, %c0_79], %206 {strides = array<i32>} : memref<2x8x32xf32, #tpu.memory_space<vmem>>, vector<2x8x32xf32>,
    %c1_i32 = arith.constant 1 : i32
    %208 = arith.cmpi eq, %arg1, %c1_i32 : i32
    %209 = arith.extui %208 : i1 to i32
    %c0_i32_80 = arith.constant 0 : i32
    %210 = arith.cmpi ne, %209, %c0_i32_80 : i32
    scf.if %210 {
      %c0_81 = arith.constant 0 : index
      %c0_82 = arith.constant 0 : index
      %c0_83 = arith.constant 0 : index
      %211 = vector.load %arg19[%c0_81, %c0_82, %c0_83] : memref<2x8x32xf32, #tpu.memory_space<vmem>>, vector<2x8x32xf32>
      %c0_84 = arith.constant 0 : index
      %c0_85 = arith.constant 0 : index
      %c0_86 = arith.constant 0 : index
      %212 = vector.load %arg18[%c0_84, %c0_85, %c0_86] : memref<2x8x32xf32, #tpu.memory_space<vmem>>, vector<2x8x32xf32>
      tpu.vector_store %arg18[%c0_84, %c0_85, %c0_86], %211 {strides = array<i32>} : memref<2x8x32xf32, #tpu.memory_space<vmem>>, vector<2x8x32xf32>,
    } else {
    }
    return
  }
  func.func @transform_0(%arg0: i32, %arg1: i32) -> (i32, i32, i32) {
    %c0_i32 = arith.constant 0 : i32
    %c0_i32_0 = arith.constant 0 : i32
    %c0_i32_1 = arith.constant 0 : i32
    return %arg0, %c0_i32, %c0_i32_0 : i32, i32, i32
  }
  func.func @transform_1(%arg0: i32, %arg1: i32) -> (i32, i32) {
    %c0_i32 = arith.constant 0 : i32
    %c0_i32_0 = arith.constant 0 : i32
    %c0_i32_1 = arith.constant 0 : i32
    return %c0_i32, %c0_i32_0 : i32, i32
  }
  func.func @transform_2(%arg0: i32, %arg1: i32) -> (i32, i32) {
    %c0_i32 = arith.constant 0 : i32
    %c0_i32_0 = arith.constant 0 : i32
    %c0_i32_1 = arith.constant 0 : i32
    return %c0_i32, %c0_i32_0 : i32, i32
  }
  func.func @transform_3(%arg0: i32, %arg1: i32) -> (i32, i32, i32) {
    %c0_i32 = arith.constant 0 : i32
    %c0_i32_0 = arith.constant 0 : i32
    %c0_i32_1 = arith.constant 0 : i32
    return %arg0, %c0_i32, %c0_i32_0 : i32, i32, i32
  }
  func.func @transform_4(%arg0: i32, %arg1: i32) -> (i32, i32, i32) {
    %c0_i32 = arith.constant 0 : i32
    %c0_i32_0 = arith.constant 0 : i32
    %c0_i32_1 = arith.constant 0 : i32
    return %arg1, %c0_i32, %c0_i32_0 : i32, i32, i32
  }
  func.func @transform_5(%arg0: i32, %arg1: i32) -> (i32, i32, i32) {
    %c0_i32 = arith.constant 0 : i32
    %c0_i32_0 = arith.constant 0 : i32
    %c0_i32_1 = arith.constant 0 : i32
    return %arg1, %c0_i32, %c0_i32_0 : i32, i32, i32
  }
  func.func @transform_6(%arg0: i32, %arg1: i32) -> (i32, i32, i32) {
    %c0_i32 = arith.constant 0 : i32
    %c0_i32_0 = arith.constant 0 : i32
    %c0_i32_1 = arith.constant 0 : i32
    return %arg1, %c0_i32, %c0_i32_0 : i32, i32, i32
  }
  func.func @transform_7(%arg0: i32, %arg1: i32) -> (i32, i32, i32) {
    %c0_i32 = arith.constant 0 : i32
    %c0_i32_0 = arith.constant 0 : i32
    %c0_i32_1 = arith.constant 0 : i32
    return %arg1, %c0_i32, %c0_i32_0 : i32, i32, i32
  }
  func.func @transform_8(%arg0: i32, %arg1: i32) -> (i32, i32, i32) {
    %c0_i32 = arith.constant 0 : i32
    %c0_i32_0 = arith.constant 0 : i32
    %c0_i32_1 = arith.constant 0 : i32
    return %arg1, %c0_i32, %c0_i32_0 : i32, i32, i32
  }
  func.func @transform_9(%arg0: i32, %arg1: i32) -> (i32, i32, i32) {
    %c0_i32 = arith.constant 0 : i32
    %c0_i32_0 = arith.constant 0 : i32
    %c0_i32_1 = arith.constant 0 : i32
    return %arg1, %c0_i32, %c0_i32_0 : i32, i32, i32
  }
  func.func @transform_10(%arg0: i32, %arg1: i32) -> (i32, i32, i32) {
    %c0_i32 = arith.constant 0 : i32
    %c0_i32_0 = arith.constant 0 : i32
    %c0_i32_1 = arith.constant 0 : i32
    return %arg1, %c0_i32, %c0_i32_0 : i32, i32, i32
  }
  func.func @transform_11(%arg0: i32, %arg1: i32) -> (i32, i32, i32) {
    %c0_i32 = arith.constant 0 : i32
    %c0_i32_0 = arith.constant 0 : i32
    %c0_i32_1 = arith.constant 0 : i32
    return %arg1, %c0_i32, %c0_i32_0 : i32, i32, i32
  }
  func.func @transform_12(%arg0: i32, %arg1: i32) -> (i32, i32, i32) {
    %c0_i32 = arith.constant 0 : i32
    %c0_i32_0 = arith.constant 0 : i32
    %c0_i32_1 = arith.constant 0 : i32
    return %arg1, %c0_i32, %c0_i32_0 : i32, i32, i32
  }
  func.func @transform_13(%arg0: i32, %arg1: i32) -> (i32, i32, i32) {
    %c0_i32 = arith.constant 0 : i32
    %c0_i32_0 = arith.constant 0 : i32
    %c0_i32_1 = arith.constant 0 : i32
    return %arg1, %c0_i32, %c0_i32_0 : i32, i32, i32
  }
  func.func @transform_14(%arg0: i32, %arg1: i32) -> (i32, i32, i32) {
    %c0_i32 = arith.constant 0 : i32
    %c0_i32_0 = arith.constant 0 : i32
    %c0_i32_1 = arith.constant 0 : i32
    return %arg1, %c0_i32, %c0_i32_0 : i32, i32, i32
  }
  func.func @transform_15(%arg0: i32, %arg1: i32) -> (i32, i32, i32) {
    %c0_i32 = arith.constant 0 : i32
    %c0_i32_0 = arith.constant 0 : i32
    %c0_i32_1 = arith.constant 0 : i32
    return %arg1, %c0_i32, %c0_i32_0 : i32, i32, i32
  }
  func.func @transform_16(%arg0: i32, %arg1: i32) -> (i32, i32, i32) {
    %c0_i32 = arith.constant 0 : i32
    %c0_i32_0 = arith.constant 0 : i32
    %c0_i32_1 = arith.constant 0 : i32
    return %arg0, %c0_i32, %c0_i32_0 : i32, i32, i32
  }
}

</mosaic_0001>

<bundles_post_ra>
// kernel: tpu_custom_call.1
= control target key start
LH: loop header
LB: loop body
LE: loop exit
PB: predicated region body
PF: predicated region fallthrough
CT: control target
= control target key end

     0   :  { %s2530_s0 = inlined_call_operand.vmem [shape: bf16[2,8,32], index: 0, kind: input, shape index: {}]   ;;  %s2531_s1 = inlined_call_operand.vmem [shape: bf16[8,32], index: 1, kind: input, shape index: {}]   ;;  %s2532_s2 = inlined_call_operand.vmem [shape: f32[8,8], index: 2, kind: input, shape index: {}]   ;;  %s2533_s3 = inlined_call_operand.vmem [shape: f32[2,1,8], index: 3, kind: input, shape index: {}]   ;;  %s2534_s4 = inlined_call_operand.vmem [shape: f32[2,1,32], index: 4, kind: input, shape index: {}]   ;;  %s2535_s5 = inlined_call_operand.vmem [shape: f32[2,1,32], index: 5, kind: input, shape index: {}]   ;;  %s2536_s6 = inlined_call_operand.vmem [shape: bf16[2,32,96], index: 6, kind: input, shape index: {}]   ;;  %s2537_s7 = inlined_call_operand.vmem [shape: f32[2,1,96], index: 7, kind: input, shape index: {}]   ;;  %s2538_s8 = inlined_call_operand.vmem [shape: bf16[2,32,32], index: 8, kind: input, shape index: {}]   ;;  %s2539_s9 = inlined_call_operand.vmem [shape: f32[2,1,32], index: 9, kind: input, shape index: {}]   ;;  %s2540_s10 = inlined_call_operand.vmem [shape: f32[2,1,32], index: 10, kind: input, shape index: {}]   ;;  %s2541_s11 = inlined_call_operand.vmem [shape: f32[2,1,32], index: 11, kind: input, shape index: {}]   ;;  %s2542_s12 = inlined_call_operand.vmem [shape: bf16[2,32,128], index: 12, kind: input, shape index: {}]   ;;  %s2543_s13 = inlined_call_operand.vmem [shape: f32[2,1,128], index: 13, kind: input, shape index: {}]   ;;  %s2544_s14 = inlined_call_operand.vmem [shape: bf16[2,128,32], index: 14, kind: input, shape index: {}]   ;;  %s2545_s15 = inlined_call_operand.vmem [shape: f32[2,1,32], index: 15, kind: input, shape index: {}]   ;;  %s2546_s16 = inlined_call_operand.hbm [shape: f32[2,8,32], index: 16, kind: output, shape index: {}]  }
   0x1   :  { %2551 = sst [smem:[#allocation10_spill]] %s2530_s0 }
   0x2   :  { %2552 = sst [smem:[#allocation11_spill]] %s2532_s2 }
   0x3   :  { %2553 = sst [smem:[#allocation12_spill]] %s2533_s3 }
   0x4   :  { %2554 = sst [smem:[#allocation13_spill]] %s2536_s6 }
   0x5   :  { %2555 = sst [smem:[#allocation14_spill]] %s2538_s8 }
   0x6   :  { %2556 = sst [smem:[#allocation15_spill]] %s2546_s16 }
   0x7   :  { %21 = vsyncpa [#allocation4], 0  ;;  %s2208_s21 = smov 0   ;;  %s2210_s22 = smov 0  }
   0x8   :  { %s2212_s23 = smov 0  }
   0x9 LB: > { %2557 = sst [smem:[#allocation6_spill]] %s2100_s22  ;;  %s36_s25 = sadd.s32 1, %s2100_s22  ;;  %s2104_s23 = sphi %s2212_s23, %s27_s23   ;;  %s2100_s22 = sphi %s2210_s22, %s2576_s22   ;;  %s2096_s21 = sphi %s2208_s21, %s2575_s21  }
   0xa   : > { %2558 = sst [smem:[#allocation7_spill]] %s2104_s23  ;;  %p37_p0 = scmp.ge.s32.totalorder %s36_s25, 2 }
   0xb   : > { %p1835_p1 = scmp.ge.s32.totalorder %s2104_s23, 1  ;;  %p590_p2 = scmp.lt.s32.totalorder %s2104_s23, 3 }
   0xc   : > { %s2578_s25 = smov (%p37_p0, %s36_s25), 0 }
   0xd   : > { %2559 = sst [smem:[#allocation8_spill]] %s2578_s25  ;;  %p591_p3 = pnand %p1835_p1, %p590_p2 }
   0xf   : > { %594 = sbr.rel (%p591_p3) target bundleno = 2046 (0x7fe), region = 84 }
  0x14   : > { %p694_p4 = scmp.lt.s32.totalorder %s2096_s21, 1  ;;  %s2560_s6 = sld [smem:[#allocation13_spill]] }
  0x15   : > { %s2561_s8 = sld [smem:[#allocation14_spill]]  ;;  %p1844_p5 = scmp.ne.s32.totalorder %s2096_s21, 0 }
  0x16   : > { %s2231_s26 = scalar_select %p694_p4, %s2096_s21, 1 }
  0x17   : > { %s2563_s27 = sld [smem:[#allocation10_spill]] (!%p1844_p5) }
  0x18   : > { %s1925_s18 = sshll.u32 %s2231_s26, 4  ;;  %s718_s3 = scalar_lea.vmem %s2540_s10, %s2231_s26 }
  0x19   : > { %s721_s24 = scalar_lea.vmem %s2541_s11, %s2231_s26  ;;  %s737_s19 = scalar_lea.vmem %s2545_s15, %s2231_s26 }
  0x1a   : > { %s2249_s25 = scalar_lea.vmem %s2560_s6, %s1925_s18  ;;  %s2271_s6 = scalar_lea.vmem %s2542_s12, %s1925_s18 }
  0x1b   : > { %s2254_s23 = scalar_lea.vmem %s2561_s8, %s1925_s18  ;;  %s729_s8 = scalar_lea.vmem %s2543_s13, %s2231_s26 }
  0x1c   : > { %2562 = sst [smem:[#allocation9_spill]] %s2254_s23  ;;  %s1928_s23 = sshll.u32 %s2231_s26, 6 }
  0x1d   : > { %s2281_s30 = scalar_lea.vmem %s2544_s14, %s1928_s23  ;;  %743 = sbr.rel (%p1844_p5) target bundleno = 42 (0x2a), region = 88 }
  0x22   : > { %v1944_v0 = vld [vmem:[%s2563_s27] sm:$0xff]   ;;  %vm752_vm0 = vcmask 261120  }
  0x23   : > { %v748_v1 = vld [vmem:[%s2531_s1] sm:$0xf]  ;;  %v1945_v2 = vunpack.c.l.bf16 %v1944_v0  ;;  %v1946_v4 = vunpack.c.h.bf16 %v1944_v0 }
  0x24   : > { %v749_v3 = vunpack.c.l.bf16 %v748_v1 }
  0x26   : > { %v750_v5 = vadd.f32 %v1945_v2, %v749_v3  ;;  %v751_v6 = vadd.f32 %v1946_v4, %v749_v3 }
  0x28   : > { %753 = vst.msk [vmem:[#allocation2] sm:$0xff] %vm752_vm0, %v750_v5 }
  0x29   : > { %754 = vst.msk [vmem:[#allocation2 + $0x8] sm:$0xff] %vm752_vm0, %v751_v6 }
  0x2a PF: > { %vm770_vm1 = vcmask 261120   ;;  %v2106_v11 = vmov 32.0   ;;  %v1930_v28 = vld [vmem:[%s2249_s25 + $0x8] sm:$0xff]  ;;  %v1929_v30 = vld [vmem:[%s2249_s25] sm:$0xff]  ;;  %s2564_s22 = scalar_lea.vmem %s2534_s4, %s2231_s26  ;;  %s2565_s17 = scalar_lea.vmem %s2535_s5, %s2231_s26  ;;  %vm877_vm9 = vcmask 64512   ;;  %vm950_vm10 = vcmask 1043456  }
  0x2b   : > { %2004 = vrcp.f32 %v2106_v11  ;;  %862 = vmatpush.bf16.msra.mxu0 %v1930_v28  ;;  %v1994_v49 = vld [vmem:[%s2564_s22] ss:$0 sm:$0xff]  ;;  %s2566_s18 = scalar_lea.vmem %s2537_s7, %s2231_s26  ;;  %s2107_s27 = smov 120   ;;  %vm1368_vm11 = vcmask 130048   ;;  %vm1373_vm12 = vcmask 195584  }
  0x2c   : > { %v1995_v54 = vld [vmem:[%s2565_s17] ss:$0 sm:$0xff]  ;;  %s2108_s28 = smov 88   ;;  %s2109_s16 = smov 96  }
  0x2d   : > { %v1996_v59 = vld [vmem:[%s2566_s18] ss:$0 sm:$0xff]  ;;  %s2110_s23 = smov 112   ;;  %s2111_s25 = smov 80  }
  0x2e   : > { %s2112_s22 = smov 104   ;;  %s2113_s2 = smov 72  }
  0x2f   : > { %v2294_v7 = vld [vmem:[#allocation2] sm:$0xff]  ;;  %863 = vmatpush.bf16.msra.mxu0 %v1929_v30  ;;  %s2114_s29 = smov 64   ;;  %s2567_s20 = sld [smem:[#allocation12_spill]] }
  0x30   : > { %v771_v8 = vsel %vm770_vm1, %v2294_v7, 0.0  ;;  %v2298_v9 = vld [vmem:[#allocation2 + $0x8] sm:$0xff]  ;;  %s2119_s17 = smov 8   ;;  %s2569_s0 = sld [smem:[#allocation9_spill]] }
  0x31   : > { %772 = vadd.xlane.f32.xlu0 %v771_v8  ;;  %v774_v10 = vsel %vm770_vm1, %v2298_v9, 0.0  ;;  %v2005_v12 = vpop.eup %2004  ;;  %s2120_s18 = smov 24   ;;  %p1920_p6 = scmp.ne.s32.totalorder %s2096_s21, 1 }
  0x32   : > { %v778_v13 = vmul.f32 32.0, %v2005_v12  ;;  %vm782_vm2 = vweird.f32 %v2005_v12 }
  0x34   : > { %v779_v14 = vsub.f32 1.0, %v778_v13 }
  0x36   : > { %v780_v15 = vmul.f32 %v2005_v12, %v779_v14 }
  0x38   : > { %v781_v16 = vadd.f32 %v2005_v12, %v780_v15 }
  0x39   : > { %775 = vadd.xlane.f32.xlu0 %v774_v10 }
  0x3a   : > { %v2302_v17 = vsel %vm782_vm2, %v2005_v12, %v781_v16 }
  0xa4   : > { %v773_v18 = vpop.xlane.xlu0 %772 }
  0xa5   : > { %v784_v19 = vmul.f32 %v2302_v17, %v773_v18 }
  0xa7   : > { %v786_v20 = vsub.f32 %v2294_v7, %v784_v19 }
  0xa9   : > { %v788_v21 = vmul.f32 %v786_v20, %v786_v20 }
  0xab   : > { %v790_v22 = vsel %vm770_vm1, %v788_v21, 0.0 }
  0xac   : > { %791 = vadd.xlane.f32.xlu1 %v790_v22  ;;  %v776_v23 = vpop.xlane.xlu0 %775 }
  0xad   : > { %v785_v24 = vmul.f32 %v2302_v17, %v776_v23 }
  0xaf   : > { %v787_v25 = vsub.f32 %v2298_v9, %v785_v24 }
  0xb1   : > { %v789_v26 = vmul.f32 %v787_v25, %v787_v25 }
  0xb3   : > { %v793_v27 = vsel %vm770_vm1, %v789_v26, 0.0 }
  0xb4   : > { %794 = vadd.xlane.f32.xlu1 %v793_v27 }
 0x11f   : > { %v792_v29 = vpop.xlane.xlu1 %791 }
 0x120   : > { %v796_v31 = vmul.f32 %v792_v29, %v2302_v17 }
 0x122   : > { %v798_v32 = vadd.f32 1e-05, %v796_v31 }
 0x124   : > { %2006 = vrsqrt.f32 %v798_v32  ;;  %vm806_vm4 = vweird.f32 %v798_v32 }
 0x127   : > { %v795_v33 = vpop.xlane.xlu1 %794 }
 0x128   : > { %v797_v34 = vmul.f32 %v795_v33, %v2302_v17  ;;  %v1997_v33 = vld [vmem:[%s2567_s20] ss:$0 sm:$0xff] }
 0x12a   : > { %v2007_v35 = vpop.eup %2006  ;;  %v799_v36 = vadd.f32 1e-05, %v797_v34 }
 0x12b   : > { %v801_v37 = vmul.f32 %v2007_v35, %v798_v32  ;;  %vm807_vm3 = vweird.f32 %v2007_v35 }
 0x12c   : > { %2008 = vrsqrt.f32 %v799_v36  ;;  %vm808_vm5 = vmor %vm806_vm4, %vm807_vm3  ;;  %vm816_vm7 = vweird.f32 %v799_v36 }
 0x12d   : > { %v802_v38 = vmul.f32 %v2007_v35, %v801_v37 }
 0x12f   : > { %v803_v39 = vmul.f32 0.5, %v802_v38 }
 0x131   : > { %v804_v40 = vsub.f32 1.5, %v803_v39  ;;  %v1998_v39 = vld [vmem:[%s2567_s20 + $0x1] ss:$0 sm:$0xff] }
 0x132   : > { %v2009_v41 = vpop.eup %2008 }
 0x133   : > { %v805_v42 = vmul.f32 %v2007_v35, %v804_v40  ;;  %v811_v43 = vmul.f32 %v2009_v41, %v799_v36  ;;  %vm817_vm6 = vweird.f32 %v2009_v41 }
 0x134   : > { %vm818_vm8 = vmor %vm816_vm7, %vm817_vm6 }
 0x135   : > { %v812_v44 = vmul.f32 %v2009_v41, %v811_v43  ;;  %v809_v45 = vsel %vm808_vm5, %v2007_v35, %v805_v42 }
 0x136   : > { %v820_v48 = vmul.f32 %v809_v45, %v786_v20 }
 0x137   : > { %v813_v46 = vmul.f32 0.5, %v812_v44 }
 0x138   : > { %v825_v53 = vmul.f32 %v1994_v49, %v820_v48 }
 0x139   : > { %v814_v47 = vsub.f32 1.5, %v813_v46 }
 0x13a   : > { %v830_v56 = vadd.f32 %v1995_v54, %v825_v53 }
 0x13b   : > { %v815_v50 = vmul.f32 %v2009_v41, %v814_v47 }
 0x13d   : > { %v819_v51 = vsel %vm818_vm8, %v2009_v41, %v815_v50 }
 0x13e   : > { %v821_v52 = vmul.f32 %v819_v51, %v787_v25 }
 0x140   : > { %v826_v55 = vmul.f32 %v1994_v49, %v821_v52 }
 0x142   : > { %v831_v57 = vadd.f32 %v1995_v54, %v826_v55 }
 0x144   : > { %v832_v58 = vpack.c.bf16 %v831_v57, %v830_v56 }
 0x146   : > { %1853 = vmatmul.msk.bf16.vlgmr.msra.gmra.mxu0 %vm770_vm1, %v832_v58 }
 0x1c3   : > { %v865_v60 = vpop.f32.mrf.mxu0 }
 0x1c4   : > { %v866_v61 = vadd.f32 %v1996_v59, %v865_v60 }
 0x1c6   : > { %v870_v62 = vpack.c.bf16 %v866_v61, %v866_v61 }
 0x1c8   : > { %v873_v63 = vunpack.c.l.b16 %v870_v62 }
 0x1ca   : > { %v2330_v0 = vpack.c.b16 %v873_v63, %v873_v63 }
 0x1cb   : > { %v867_v1 = vpop.f32.mrf.mxu0 }
 0x1cc   : > { %v868_v2 = vadd.f32 %v1996_v59, %v867_v1  ;;  %990 = vrot.lane.b32.xlu1 %v2330_v0, %s2107_s27  ;;  %992 = vrot.lane.b32.xlu0 %v2330_v0, %s2108_s28 }
 0x1cd   : > { %875 = vrot.lane.b32.xlu2 %v2330_v0, %s2109_s16 }
 0x1ce   : > { %v871_v3 = vpack.c.bf16 %v868_v2, %v868_v2 }
 0x1d0   : > { %v898_v4 = vunpack.c.l.b16 %v871_v3 }
 0x1d2   : > { %v2335_v5 = vpack.c.b16 %v898_v4, %v898_v4 }
 0x1d4   : > { %1127 = vrot.lane.b32.xlu1 %v2335_v5, %s2110_s23  ;;  %1129 = vrot.lane.b32.xlu0 %v2335_v5, %s2111_s25 }
 0x1d5   : > { %900 = vrot.lane.b32.xlu2 %v2335_v5, %s2109_s16  ;;  %s2570_s16 = scalar_lea.vmem %s2539_s9, %s2231_s26 }
 0x1dc   : > { %1218 = vrot.lane.b32.xlu1 %v2330_v0, %s2112_s22  ;;  %1220 = vrot.lane.b32.xlu0 %v2330_v0, %s2113_s2 }
 0x1dd   : > { %1015 = vrot.lane.b32.xlu2 %v2335_v5, %s2108_s28  ;;  %s2568_s28 = sld [smem:[#allocation11_spill]] }
 0x1e3   : > { %v757_v34 = vld [vmem:[%s2568_s28] sm:$0xff] }
 0x1e4   : > { %1241 = vrot.lane.b32.xlu0 %v2335_v5, %s2112_s22  ;;  %v766_v35 = vadd.f32 %v1997_v33, %v757_v34  ;;  %v767_v41 = vadd.f32 %v1998_v39, %v757_v34  ;;  %s2116_s22 = smov 56  }
 0x1e5   : > { %1013 = vrot.lane.b32.xlu2 %v2335_v5, %s2107_s27 }
 0x1ec   : > { %945 = vrot.lane.b32.xlu0 %v2330_v0, %s2114_s29 }
 0x1ed   : > { %1106 = vrot.lane.b32.xlu2 %v2330_v0, %s2111_s25  ;;  %s2115_s25 = smov 48  }
 0x1f5   : > { %1104 = vrot.lane.b32.xlu2 %v2330_v0, %s2110_s23 }
 0x1fd   : > { %1243 = vrot.lane.b32.xlu2 %v2335_v5, %s2113_s2  ;;  %s2117_s2 = smov 40  }
 0x227   : > { %v876_v6 = vpop.permute.xlu2 %875 }
 0x228   : > { %v882_v8 = vsel %vm877_vm9, %v876_v6, 0 }
 0x229   : > { %891 = vmatpush.bf16.xpose.msra.mxu1 %v882_v8 }
 0x22f   : > { %v901_v10 = vpop.permute.xlu2 %900 }
 0x230   : > { %1854 = vmatmul.msk.bf16.vlgmr.msra.gmra.mxu1 %vm877_vm9, %v870_v62  ;;  %v906_v11 = vsel %vm877_vm9, %v901_v10, 0 }
 0x231   : > { %915 = vmatpush.bf16.xpose.msra.mxu2 %v906_v11 }
 0x237   : > { %v1016_v12 = vpop.permute.xlu2 %1015 }
 0x238   : > { %1855 = vmatmul.msk.bf16.vlgmr.msra.gmra.mxu2 %vm877_vm9, %v871_v3  ;;  %v1021_v13 = vsel %vm877_vm9, %v1016_v12, 0 }
 0x239   : > { %1030 = vmatpush.bf16.xpose.msrb.mxu1 %v1021_v13 }
 0x23e   : > { %v993_v14 = vpop.permute.xlu0 %992  ;;  %v991_v18 = vpop.permute.xlu1 %990 }
 0x23f   : > { %v1014_v15 = vpop.permute.xlu2 %1013  ;;  %v998_v16 = vsel %vm877_vm9, %v993_v14, 0 }
 0x240   : > { %1859 = vmatmul.msk.bf16.vlgmr.msrb.gmra.mxu1 %vm877_vm9, %v1014_v15  ;;  %1007 = vmatpush.bf16.xpose.msrb.mxu0 %v998_v16 }
 0x246   : > { %v1130_v19 = vpop.permute.xlu0 %1129  ;;  %v1128_v24 = vpop.permute.xlu1 %1127 }
 0x247   : > { %v1135_v20 = vsel %vm877_vm9, %v1130_v19, 0  ;;  %v1107_v21 = vpop.permute.xlu2 %1106  ;;  %1858 = vmatmul.msk.bf16.vlgmr.msrb.gmra.mxu0 %vm877_vm9, %v991_v18 }
 0x248   : > { %v1112_v22 = vsel %vm877_vm9, %v1107_v21, 0  ;;  %1144 = vmatpush.bf16.xpose.msra.mxu1 %v1135_v20 }
 0x249   : > { %1121 = vmatpush.bf16.xpose.msra.mxu0 %v1112_v22 }
 0x24e   : > { %v1221_v23 = vpop.permute.xlu0 %1220  ;;  %v1219_v32 = vpop.permute.xlu1 %1218 }
 0x24f   : > { %v1226_v25 = vsel %vm877_vm9, %v1221_v23, 0  ;;  %v1105_v26 = vpop.permute.xlu2 %1104 }
 0x250   : > { %1863 = vmatmul.msk.bf16.vlgmr.msra.gmra.mxu1 %vm877_vm9, %v1128_v24 }
 0x251   : > { %1235 = vmatpush.bf16.xpose.msrb.mxu0 %v1226_v25 }
 0x256   : > { %v1242_v27 = vpop.permute.xlu0 %1241 }
 0x257   : > { %v1244_v28 = vpop.permute.xlu2 %1243  ;;  %1862 = vmatmul.msk.bf16.vlgmr.msra.gmra.mxu0 %vm877_vm9, %v1105_v26 }
 0x258   : > { %v1249_v29 = vsel %vm877_vm9, %v1244_v28, 0 }
 0x259   : > { %1258 = vmatpush.bf16.xpose.msrb.mxu1 %v1249_v29 }
 0x25e   : > { %v946_v30 = vpop.permute.xlu0 %945 }
 0x25f   : > { %v952_v31 = vsel %vm950_vm10, %v946_v30, 0 }
 0x260   : > { %1867 = vmatmul.msk.bf16.vlgmr.msrb.gmra.mxu1 %vm877_vm9, %v1242_v27  ;;  %961 = vmatpush.bf16.msra.mxu3 %v952_v31 }
 0x267   : > { %1866 = vmatmul.msk.bf16.vlgmr.msrb.gmra.mxu0 %vm877_vm9, %v1219_v32 }
 0x2ad   : > { %v893_v36 = vpop.f32.mrf.mxu1 }
 0x2ae   : > { %v894_v37 = vadd.f32 %v893_v36, %v766_v35 }
 0x2b0   : > { %v921_v38 = vsel %vm877_vm9, %v894_v37, -inf }
 0x2b1   : > { %922 = vmax.xlane.f32.xlu2 %v921_v38 }
 0x2b5   : > { %v895_v40 = vpop.f32.mrf.mxu1 }
 0x2bb   : > { %v917_v42 = vpop.f32.mrf.mxu2 }
 0x2bc   : > { %v918_v43 = vadd.f32 %v917_v42, %v767_v41 }
 0x2bd   : > { %v1032_v44 = vpop.f32.mrf.mxu1 }
 0x2be   : > { %v2377_v45 = vadd.f32 %v1032_v44, %v767_v41  ;;  %v924_v46 = vsel %vm877_vm9, %v918_v43, -inf }
 0x2bf   : > { %925 = vmax.xlane.f32.xlu1 %v924_v46 }
 0x2c0   : > { %v1039_v47 = vsel %vm877_vm9, %v2377_v45, -inf }
 0x2c1   : > { %1040 = vmax.xlane.f32.xlu2 %v1039_v47 }
 0x2c3   : > { %v919_v48 = vpop.f32.mrf.mxu2 }
 0x2c4   : > { %v1009_v49 = vpop.f32.mrf.mxu0 }
 0x2c5   : > { %v1010_v50 = vadd.f32 %v1009_v49, %v766_v35  ;;  %v1034_v51 = vpop.f32.mrf.mxu1 }
 0x2c7   : > { %v1036_v52 = vsel %vm877_vm9, %v1010_v50, -inf }
 0x2c8   : > { %1037 = vmax.xlane.f32.xlu0 %v1036_v52 }
 0x2cc   : > { %v1011_v53 = vpop.f32.mrf.mxu0 }
 0x2cd   : > { %v1146_v54 = vpop.f32.mrf.mxu1 }
 0x2ce   : > { %v2383_v55 = vadd.f32 %v1146_v54, %v767_v41 }
 0x2d0   : > { %v1153_v56 = vsel %vm877_vm9, %v2383_v55, -inf }
 0x2d1   : > { %1154 = vmax.xlane.f32.xlu1 %v1153_v56 }
 0x2d4   : > { %v1123_v57 = vpop.f32.mrf.mxu0 }
 0x2d5   : > { %v1124_v58 = vadd.f32 %v1123_v57, %v766_v35  ;;  %v1148_v59 = vpop.f32.mrf.mxu1 }
 0x2d7   : > { %v1150_v60 = vsel %vm877_vm9, %v1124_v58, -inf }
 0x2d8   : > { %1151 = vmax.xlane.f32.xlu2 %v1150_v60 }
 0x2dc   : > { %v1125_v61 = vpop.f32.mrf.mxu0 }
 0x2dd   : > { %v1260_v62 = vpop.f32.mrf.mxu1 }
 0x2de   : > { %v2388_v63 = vadd.f32 %v1260_v62, %v767_v41 }
 0x2e0   : > { %v1267_v1 = vsel %vm877_vm9, %v2388_v63, -inf }
 0x2e1   : > { %1268 = vmax.xlane.f32.xlu0 %v1267_v1 }
 0x2e4   : > { %v1237_v2 = vpop.f32.mrf.mxu0 }
 0x2e5   : > { %v1238_v3 = vadd.f32 %v1237_v2, %v766_v35  ;;  %v1262_v4 = vpop.f32.mrf.mxu1 }
 0x2e7   : > { %v1264_v6 = vsel %vm877_vm9, %v1238_v3, -inf }
 0x2e8   : > { %1265 = vmax.xlane.f32.xlu2 %v1264_v6 }
 0x2ec   : > { %v1239_v8 = vpop.f32.mrf.mxu0 }
 0x2f5   : > { %1174 = vrot.lane.b32.xlu0 %v2330_v0, %s2115_s25 }
 0x300   : > { %1060 = vrot.lane.b32.xlu2 %v2330_v0, %s2116_s22 }
 0x324   : > { %v923_v10 = vpop.xlane.xlu2 %922 }
 0x325   : > { %v927_v11 = vsub.f32 %v894_v37, %v923_v10 }
 0x327   : > { %v929_v12 = vmul.f32 1.442695, %v927_v11 }
 0x329   : > { %2010 = vpow2.f32 %v929_v12 }
 0x32f   : > { %v2011_v13 = vpop.eup %2010 }
 0x330   : > { %v933_v14 = vsel %vm877_vm9, %v2011_v13, 0.0 }
 0x331   : > { %934 = vadd.xlane.f32.xlu1 %v933_v14 }
 0x332   : > { %v926_v15 = vpop.xlane.xlu1 %925 }
 0x333   : > { %v928_v19 = vsub.f32 %v918_v43, %v926_v15 }
 0x334   : > { %v1041_v22 = vpop.xlane.xlu2 %1040 }
 0x335   : > { %v931_v21 = vmul.f32 1.442695, %v928_v19  ;;  %v1043_v36 = vsub.f32 %v2377_v45, %v1041_v22 }
 0x337   : > { %v1046_v38 = vmul.f32 1.442695, %v1043_v36 }
 0x33b   : > { %v1038_v16 = vpop.xlane.xlu0 %1037 }
 0x33c   : > { %v1042_v18 = vsub.f32 %v1010_v50, %v1038_v16 }
 0x33e   : > { %v1044_v20 = vmul.f32 1.442695, %v1042_v18 }
 0x340   : > { %2012 = vpow2.f32 %v1044_v20 }
 0x341   : > { %2014 = vpow2.f32 %v931_v21 }
 0x344   : > { %v1155_v44 = vpop.xlane.xlu1 %1154 }
 0x345   : > { %v1157_v45 = vsub.f32 %v2383_v55, %v1155_v44 }
 0x346   : > { %v2398_v23 = vpop.eup %2012 }
 0x347   : > { %v1048_v24 = vsel %vm877_vm9, %v2398_v23, 0.0  ;;  %v2015_v26 = vpop.eup %2014  ;;  %v1160_v46 = vmul.f32 1.442695, %v1157_v45 }
 0x348   : > { %1049 = vadd.xlane.f32.xlu2 %v1048_v24  ;;  %v936_v29 = vsel %vm877_vm9, %v2015_v26, 0.0 }
 0x34a   : > { %967 = vrot.lane.b32.xlu1 %v2335_v5, %s2114_s29  ;;  %s2118_s29 = smov 16  }
 0x34b   : > { %v1152_v25 = vpop.xlane.xlu2 %1151 }
 0x34c   : > { %v1156_v27 = vsub.f32 %v1124_v58, %v1152_v25 }
 0x34e   : > { %v1158_v28 = vmul.f32 1.442695, %v1156_v27 }
 0x350   : > { %2016 = vpow2.f32 %v1158_v28  ;;  %937 = vadd.xlane.f32.xlu2 %v936_v29 }
 0x354   : > { %v1269_v35 = vpop.xlane.xlu0 %1268 }
 0x355   : > { %v1271_v50 = vsub.f32 %v2388_v63, %v1269_v35 }
 0x356   : > { %v2405_v30 = vpop.eup %2016 }
 0x357   : > { %v1162_v31 = vsel %vm877_vm9, %v2405_v30, 0.0  ;;  %v1274_v51 = vmul.f32 1.442695, %v1271_v50 }
 0x358   : > { %1163 = vadd.xlane.f32.xlu0 %v1162_v31 }
 0x35b   : > { %v1266_v32 = vpop.xlane.xlu2 %1265 }
 0x35c   : > { %v1270_v33 = vsub.f32 %v1238_v3, %v1266_v32 }
 0x35e   : > { %v1272_v34 = vmul.f32 1.442695, %v1270_v33 }
 0x360   : > { %2018 = vpow2.f32 %v1272_v34 }
 0x361   : > { %2020 = vpow2.f32 %v1046_v38 }
 0x362   : > { %2022 = vpow2.f32 %v1160_v46 }
 0x363   : > { %v1061_v56 = vpop.permute.xlu2 %1060 }
 0x364   : > { %v1066_v60 = vsel %vm950_vm10, %v1061_v56, 0 }
 0x366   : > { %v2410_v37 = vpop.eup %2018 }
 0x367   : > { %v1175_v39 = vpop.permute.xlu0 %1174  ;;  %v1276_v40 = vsel %vm877_vm9, %v2410_v37, 0.0  ;;  %v2021_v42 = vpop.eup %2020 }
 0x368   : > { %1081 = vrot.lane.b32.xlu2 %v2335_v5, %s2116_s22  ;;  %v1180_v41 = vsel %vm950_vm10, %v1175_v39, 0  ;;  %1277 = vadd.xlane.f32.xlu0 %v1276_v40  ;;  %v1051_v43 = vsel %vm877_vm9, %v2021_v42, 0.0  ;;  %v2420_v47 = vpop.eup %2022 }
 0x369   : > { %1189 = vmatpush.bf16.msrb.mxu2 %v1180_v41  ;;  %v1165_v48 = vsel %vm877_vm9, %v2420_v47, 0.0 }
 0x374   : > { %1052 = vadd.xlane.f32.xlu1 %v1051_v43 }
 0x37c   : > { %1309 = vrot.lane.b32.xlu0 %v2335_v5, %s2117_s2 }
 0x38d   : > { %1195 = vrot.lane.b32.xlu1 %v2335_v5, %s2115_s25 }
 0x391   : > { %1166 = vadd.xlane.f32.xlu2 %v1165_v48 }
 0x3a4   : > { %v935_v49 = vpop.xlane.xlu1 %934 }
 0x3a5   : > { %2024 = vrcp.f32 %v935_v49 }
 0x3a6   : > { %2026 = vpow2.f32 %v1274_v51 }
 0x3a9   : > { %1288 = vrot.lane.b32.xlu2 %v2330_v0, %s2117_s2 }
 0x3ab   : > { %v2025_v52 = vpop.eup %2024 }
 0x3ac   : > { %v941_v53 = vmul.f32 %v2025_v52, %v2011_v13  ;;  %v2027_v55 = vpop.eup %2026 }
 0x3ad   : > { %v1279_v5 = vsel %vm877_vm9, %v2027_v55, 0.0 }
 0x3ae   : > { %v943_v54 = vpack.c.bf16 %v941_v53, %v941_v53 }
 0x3b0   : > { %1856 = vmatmul.msk.bf16.vlgmr.msra.gmra.mxu3 %vm877_vm9, %v943_v54 }
 0x3b7   : > { %1280 = vadd.xlane.f32.xlu1 %v1279_v5 }
 0x3bb   : > { %v1050_v57 = vpop.xlane.xlu2 %1049 }
 0x3bc   : > { %v968_v58 = vpop.permute.xlu1 %967 }
 0x3bd   : > { %v973_v59 = vsel %vm950_vm10, %v968_v58, 0 }
 0x3be   : > { %982 = vmatpush.bf16.msrb.mxu3 %v973_v59 }
 0x3c2   : > { %1075 = vmatpush.bf16.msra.mxu3 %v1066_v60 }
 0x3c3   : > { %v938_v0 = vpop.xlane.xlu2 %937 }
 0x3c4   : > { %2028 = vrcp.f32 %v938_v0 }
 0x3ca   : > { %v2029_v61 = vpop.eup %2028 }
 0x3cb   : > { %v942_v62 = vmul.f32 %v2029_v61, %v2015_v26  ;;  %v1164_v63 = vpop.xlane.xlu0 %1163  ;;  %v1082_v1 = vpop.permute.xlu2 %1081 }
 0x3cc   : > { %2030 = vrcp.f32 %v1164_v63  ;;  %v1087_v3 = vsel %vm950_vm10, %v1082_v1, 0 }
 0x3cd   : > { %v944_v2 = vpack.c.bf16 %v942_v62, %v942_v62  ;;  %2032 = vrcp.f32 %v1050_v57 }
 0x3cf   : > { %1857 = vmatmul.msk.bf16.vlgmr.msrb.gmra.mxu3 %vm877_vm9, %v944_v2 }
 0x3d0   : > { %1096 = vmatpush.bf16.msrb.mxu3 %v1087_v3 }
 0x3d2   : > { %v2031_v4 = vpop.eup %2030 }
 0x3d3   : > { %v1170_v6 = vmul.f32 %v2031_v4, %v2405_v30  ;;  %v2033_v10 = vpop.eup %2032 }
 0x3d4   : > { %v1056_v11 = vmul.f32 %v2033_v10, %v2398_v23 }
 0x3d5   : > { %v1172_v8 = vpack.c.bf16 %v1170_v6, %v1170_v6  ;;  %v1932_v6 = vld [vmem:[%s2569_s0 + $0x8] sm:$0xff] }
 0x3d6   : > { %v1058_v12 = vpack.c.bf16 %v1056_v11, %v1056_v11  ;;  %1408 = vmatpush.bf16.msra.mxu0 %v1932_v6 }
 0x3d7   : > { %1864 = vmatmul.msk.bf16.vlgmr.msrb.gmra.mxu2 %vm877_vm9, %v1172_v8  ;;  %v1931_v8 = vld [vmem:[%s2569_s0] sm:$0xff] }
 0x3da   : > { %1409 = vmatpush.bf16.msra.mxu0 %v1931_v8 }
 0x3db   : > { %v1278_v18 = vpop.xlane.xlu0 %1277 }
 0x3df   : > { %1860 = vmatmul.msk.bf16.vlgmr.msra.gmra.mxu3 %vm877_vm9, %v1058_v12 }
 0x3e7   : > { %v1053_v13 = vpop.xlane.xlu1 %1052 }
 0x3e8   : > { %2034 = vrcp.f32 %v1053_v13 }
 0x3e9   : > { %2036 = vrcp.f32 %v1278_v18 }
 0x3ee   : > { %v2035_v14 = vpop.eup %2034  ;;  %v1310_v19 = vpop.permute.xlu0 %1309 }
 0x3ef   : > { %v1057_v15 = vmul.f32 %v2035_v14, %v2021_v42  ;;  %v1315_v22 = vsel %vm950_vm10, %v1310_v19, 0  ;;  %v2037_v24 = vpop.eup %2036 }
 0x3f0   : > { %v1284_v26 = vmul.f32 %v2037_v24, %v2410_v37 }
 0x3f1   : > { %v1059_v16 = vpack.c.bf16 %v1057_v15, %v1057_v15 }
 0x3f2   : > { %v1286_v31 = vpack.c.bf16 %v1284_v26, %v1284_v26 }
 0x3f3   : > { %1861 = vmatmul.msk.bf16.vlgmr.msrb.gmra.mxu3 %vm877_vm9, %v1059_v16 }
 0x3ff   : > { %v1196_v20 = vpop.permute.xlu1 %1195 }
 0x400   : > { %v1201_v21 = vsel %vm950_vm10, %v1196_v20, 0 }
 0x401   : > { %1210 = vmatpush.bf16.msra.mxu3 %v1201_v21 }
 0x404   : > { %v1167_v23 = vpop.xlane.xlu2 %1166 }
 0x405   : > { %1324 = vmatpush.bf16.msrb.mxu3 %v1315_v22  ;;  %2038 = vrcp.f32 %v1167_v23 }
 0x40b   : > { %v2039_v25 = vpop.eup %2038 }
 0x40c   : > { %v1171_v27 = vmul.f32 %v2039_v25, %v2420_v47  ;;  %v1289_v28 = vpop.permute.xlu2 %1288 }
 0x40d   : > { %v1294_v29 = vsel %vm950_vm10, %v1289_v28, 0  ;;  %v1999_v28 = vld [vmem:[%s2570_s16] ss:$0 sm:$0xff] }
 0x40e   : > { %v1173_v30 = vpack.c.bf16 %v1171_v27, %v1171_v27  ;;  %1303 = vmatpush.bf16.msra.mxu2 %v1294_v29 }
 0x410   : > { %1865 = vmatmul.msk.bf16.vlgmr.msra.gmra.mxu3 %vm877_vm9, %v1173_v30 }
 0x411   : > { %1868 = vmatmul.msk.bf16.vlgmr.msra.gmra.mxu2 %vm877_vm9, %v1286_v31 }
 0x42a   : > { %v1281_v32 = vpop.xlane.xlu1 %1280 }
 0x42b   : > { %2040 = vrcp.f32 %v1281_v32 }
 0x431   : > { %v2041_v33 = vpop.eup %2040 }
 0x432   : > { %v1285_v34 = vmul.f32 %v2041_v33, %v2027_v55 }
 0x433   : > { %v963_v35 = vpop.f32.mrf.mxu3 }
 0x434   : > { %v1287_v36 = vpack.c.bf16 %v1285_v34, %v1285_v34  ;;  %v988_v13 = vpack.c.bf16 %v963_v35, %v963_v35 }
 0x436   : > { %1869 = vmatmul.msk.bf16.vlgmr.msrb.gmra.mxu3 %vm877_vm9, %v1287_v36 }
 0x43b   : > { %v965_v37 = vpop.f32.mrf.mxu3 }
 0x452   : > { %v984_v38 = vpop.f32.mrf.mxu3 }
 0x453   : > { %v989_v16 = vpack.c.bf16 %v984_v38, %v984_v38 }
 0x45a   : > { %v986_v39 = vpop.f32.mrf.mxu3  ;;  %v1191_v40 = vpop.f32.mrf.mxu2 }
 0x45b   : > { %v1216_v41 = vpack.c.bf16 %v1191_v40, %v1191_v40 }
 0x45d   : > { %v1344_v42 = vunpack.c.l.b16 %v1216_v41 }
 0x45f   : > { %v1346_v43 = vpack.c.b16 %v1344_v42, %v1344_v42 }
 0x461   : > { %1348 = vrot.lane.b32.xlu1 %v1346_v43, %s2118_s29 }
 0x462   : > { %v1077_v44 = vpop.f32.mrf.mxu3  ;;  %v1193_v45 = vpop.f32.mrf.mxu2 }
 0x463   : > { %v1102_v46 = vpack.c.bf16 %v1077_v44, %v1077_v44  ;;  %v1934_v45 = vld [vmem:[%s2271_s6 + $0x8] sm:$0xff] }
 0x464   : > { %1510 = vmatpush.bf16.msra.mxu1 %v1934_v45 }
 0x465   : > { %v1334_v47 = vunpack.c.l.b16 %v1102_v46 }
 0x467   : > { %v1336_v48 = vpack.c.b16 %v1334_v47, %v1334_v47 }
 0x469   : > { %1338 = vrot.lane.b32.xlu2 %v1336_v48, %s2119_s17  ;;  %v1933_v48 = vld [vmem:[%s2271_s6] sm:$0xff] }
 0x46a   : > { %v1079_v49 = vpop.f32.mrf.mxu3  ;;  %1511 = vmatpush.bf16.msra.mxu1 %v1933_v48 }
 0x476   : > { %v1098_v50 = vpop.f32.mrf.mxu3 }
 0x477   : > { %v1103_v51 = vpack.c.bf16 %v1098_v50, %v1098_v50 }
 0x479   : > { %v1335_v52 = vunpack.c.l.b16 %v1103_v51 }
 0x47b   : > { %v1337_v53 = vpack.c.b16 %v1335_v52, %v1335_v52 }
 0x47d   : > { %1340 = vrot.lane.b32.xlu2 %v1337_v53, %s2119_s17 }
 0x47e   : > { %v1100_v54 = vpop.f32.mrf.mxu3 }
 0x493   : > { %v1212_v55 = vpop.f32.mrf.mxu3 }
 0x494   : > { %v1217_v56 = vpack.c.bf16 %v1212_v55, %v1212_v55  ;;  %v1305_v5 = vpop.f32.mrf.mxu2 }
 0x495   : > { %v1330_v57 = vpack.c.bf16 %v1305_v5, %v1305_v5 }
 0x496   : > { %v1345_v58 = vunpack.c.l.b16 %v1217_v56 }
 0x497   : > { %v1354_v59 = vunpack.c.l.b16 %v1330_v57 }
 0x498   : > { %v1347_v60 = vpack.c.b16 %v1345_v58, %v1345_v58 }
 0x499   : > { %v1356_v0 = vpack.c.b16 %v1354_v59, %v1354_v59 }
 0x49a   : > { %1350 = vrot.lane.b32.xlu2 %v1347_v60, %s2118_s29 }
 0x49b   : > { %v1214_v61 = vpop.f32.mrf.mxu3  ;;  %1358 = vrot.lane.b32.xlu0 %v1356_v0, %s2120_s18 }
 0x49c   : > { %v1307_v62 = vpop.f32.mrf.mxu2 }
 0x4b9   : > { %v1326_v63 = vpop.f32.mrf.mxu3 }
 0x4ba   : > { %v1331_v1 = vpack.c.bf16 %v1326_v63, %v1326_v63 }
 0x4bc   : > { %v1355_v2 = vunpack.c.l.b16 %v1331_v1 }
 0x4be   : > { %v1357_v3 = vpack.c.b16 %v1355_v2, %v1355_v2 }
 0x4c0   : > { %1360 = vrot.lane.b32.xlu2 %v1357_v3, %s2120_s18  ;;  %v2001_v3 = vld [vmem:[%s721_s24] ss:$0 sm:$0xff] }
 0x4c1   : > { %v1328_v4 = vpop.f32.mrf.mxu3 }
 0x4c3   : > { %v1339_v10 = vpop.permute.xlu2 %1338 }
 0x4c4   : > { %v1364_v18 = vsel %vm877_vm9, %v988_v13, %v1339_v10  ;;  %v1942_v13 = vld [vmem:[%s2281_s30 + $0x38] sm:$0xff] }
 0x4c5   : > { %1605 = vmatpush.bf16.msrb.mxu2 %v1942_v13 }
 0x4d3   : > { %v1349_v14 = vpop.permute.xlu1 %1348 }
 0x4d4   : > { %v1370_v19 = vsel %vm1368_vm11, %v1364_v18, %v1349_v14  ;;  %v1941_v14 = vld [vmem:[%s2281_s30 + $0x30] sm:$0xff]  ;;  %v1938_v18 = vld [vmem:[%s2281_s30 + $0x18] sm:$0xff] }
 0x4d5   : > { %1606 = vmatpush.bf16.msrb.mxu2 %v1941_v14 }
 0x4d7   : > { %v1341_v11 = vpop.permute.xlu2 %1340 }
 0x4d8   : > { %v1367_v20 = vsel %vm877_vm9, %v989_v16, %v1341_v11  ;;  %v1939_v16 = vld [vmem:[%s2281_s30 + $0x20] sm:$0xff] }
 0x4f4   : > { %v1351_v12 = vpop.permute.xlu2 %1350 }
 0x4f5   : > { %v1372_v22 = vsel %vm1368_vm11, %v1367_v20, %v1351_v12  ;;  %v1936_v20 = vld [vmem:[%s2281_s30 + $0x8] sm:$0xff] }
 0x50d   : > { %v1359_v15 = vpop.permute.xlu0 %1358 }
 0x50e   : > { %v1375_v21 = vsel %vm1373_vm12, %v1370_v19, %v1359_v15  ;;  %v1940_v15 = vld [vmem:[%s2281_s30 + $0x28] sm:$0xff]  ;;  %v1937_v19 = vld [vmem:[%s2281_s30 + $0x10] sm:$0xff] }
 0x50f   : > { %v1384_v25 = vunpack.c.l.b16 %v1375_v21  ;;  %1607 = vmatpush.bf16.msrb.mxu2 %v1940_v15  ;;  %v2002_v21 = vld [vmem:[%s729_s8] ss:$0 sm:$0xff] }
 0x513   : > { %1608 = vmatpush.bf16.msrb.mxu2 %v1939_v16 }
 0x517   : > { %1609 = vmatpush.bf16.msrb.mxu2 %v1938_v18 }
 0x51a   : > { %v1361_v23 = vpop.permute.xlu2 %1360 }
 0x51b   : > { %v1377_v24 = vsel %vm1373_vm12, %v1372_v22, %v1361_v23  ;;  %1610 = vmatpush.bf16.msrb.mxu2 %v1937_v19  ;;  %v1935_v22 = vld [vmem:[%s2281_s30] sm:$0xff] }
 0x51c   : > { %v1385_v26 = vunpack.c.l.b16 %v1377_v24 }
 0x51e   : > { %v1386_v27 = vpack.c.b16 %v1385_v26, %v1384_v25 }
 0x51f   : > { %1611 = vmatpush.bf16.msrb.mxu2 %v1936_v20 }
 0x520   : > { %1878 = vmatmul.msk.bf16.vlgmr.msra.gmra.mxu0 %vm770_vm1, %v1386_v27 }
 0x523   : > { %1612 = vmatpush.bf16.msrb.mxu2 %v1935_v22 }
 0x59d   : > { %v1411_v29 = vpop.f32.mrf.mxu0 }
 0x59e   : > { %v1416_v30 = vadd.f32 %v1411_v29, %v2294_v7 }
 0x5a0   : > { %v2460_v31 = vadd.f32 %v1999_v28, %v1416_v30 }
 0x5a2   : > { %v1426_v32 = vsel %vm770_vm1, %v2460_v31, 0.0 }
 0x5a3   : > { %1427 = vadd.xlane.f32.xlu0 %v1426_v32 }
 0x5a5   : > { %v1413_v33 = vpop.f32.mrf.mxu0 }
 0x5a6   : > { %v1417_v34 = vadd.f32 %v1413_v33, %v2298_v9 }
 0x5a8   : > { %v2465_v35 = vadd.f32 %v1999_v28, %v1417_v34 }
 0x5aa   : > { %v1429_v36 = vsel %vm770_vm1, %v2465_v35, 0.0 }
 0x5ab   : > { %1430 = vadd.xlane.f32.xlu2 %v1429_v36 }
 0x616   : > { %v1428_v37 = vpop.xlane.xlu0 %1427 }
 0x617   : > { %v1432_v7 = vmul.f32 %v1428_v37, %v2302_v17 }
 0x619   : > { %v1434_v38 = vsub.f32 %v2460_v31, %v1432_v7 }
 0x61b   : > { %v1436_v39 = vmul.f32 %v1434_v38, %v1434_v38 }
 0x61d   : > { %v1438_v40 = vsel %vm770_vm1, %v1436_v39, 0.0 }
 0x61e   : > { %1439 = vadd.xlane.f32.xlu1 %v1438_v40  ;;  %v1431_v41 = vpop.xlane.xlu2 %1430 }
 0x61f   : > { %v1433_v9 = vmul.f32 %v1431_v41, %v2302_v17 }
 0x621   : > { %v1435_v42 = vsub.f32 %v2465_v35, %v1433_v9 }
 0x623   : > { %v1437_v43 = vmul.f32 %v1435_v42, %v1435_v42 }
 0x625   : > { %v1441_v44 = vsel %vm770_vm1, %v1437_v43, 0.0 }
 0x626   : > { %1442 = vadd.xlane.f32.xlu0 %v1441_v44 }
 0x691   : > { %v1440_v46 = vpop.xlane.xlu1 %1439 }
 0x692   : > { %v1444_v47 = vmul.f32 %v1440_v46, %v2302_v17  ;;  %v2003_v46 = vld [vmem:[%s737_s19] ss:$0 sm:$0xff] }
 0x694   : > { %v1446_v49 = vadd.f32 1e-05, %v1444_v47 }
 0x696   : > { %2042 = vrsqrt.f32 %v1446_v49  ;;  %vm1454_vm14 = vweird.f32 %v1446_v49 }
 0x699   : > { %v1443_v50 = vpop.xlane.xlu0 %1442 }
 0x69a   : > { %v1445_v51 = vmul.f32 %v1443_v50, %v2302_v17  ;;  %v2000_v17 = vld [vmem:[%s718_s3] ss:$0 sm:$0xff] }
 0x69c   : > { %v2043_v52 = vpop.eup %2042  ;;  %v1447_v53 = vadd.f32 1e-05, %v1445_v51 }
 0x69d   : > { %v1449_v54 = vmul.f32 %v2043_v52, %v1446_v49  ;;  %vm1455_vm13 = vweird.f32 %v2043_v52 }
 0x69e   : > { %2044 = vrsqrt.f32 %v1447_v53  ;;  %vm1456_vm15 = vmor %vm1454_vm14, %vm1455_vm13  ;;  %vm1464_vm2 = vweird.f32 %v1447_v53 }
 0x69f   : > { %v1450_v55 = vmul.f32 %v2043_v52, %v1449_v54 }
 0x6a1   : > { %v1451_v56 = vmul.f32 0.5, %v1450_v55 }
 0x6a3   : > { %v1452_v5 = vsub.f32 1.5, %v1451_v56 }
 0x6a4   : > { %v2045_v57 = vpop.eup %2044 }
 0x6a5   : > { %v1453_v58 = vmul.f32 %v2043_v52, %v1452_v5  ;;  %v1459_v59 = vmul.f32 %v2045_v57, %v1447_v53  ;;  %vm1465_vm0 = vweird.f32 %v2045_v57 }
 0x6a6   : > { %vm1466_vm3 = vmor %vm1464_vm2, %vm1465_vm0 }
 0x6a7   : > { %v1460_v60 = vmul.f32 %v2045_v57, %v1459_v59  ;;  %v1457_v0 = vsel %vm1456_vm15, %v2043_v52, %v1453_v58 }
 0x6a8   : > { %v1468_v63 = vmul.f32 %v1457_v0, %v1434_v38 }
 0x6a9   : > { %v1461_v61 = vmul.f32 0.5, %v1460_v60 }
 0x6aa   : > { %v1473_v4 = vmul.f32 %v2000_v17, %v1468_v63 }
 0x6ab   : > { %v1462_v62 = vsub.f32 1.5, %v1461_v61 }
 0x6ac   : > { %v1478_v10 = vadd.f32 %v2001_v3, %v1473_v4 }
 0x6ad   : > { %v1463_v1 = vmul.f32 %v2045_v57, %v1462_v62 }
 0x6af   : > { %v1467_v2 = vsel %vm1466_vm3, %v2045_v57, %v1463_v1 }
 0x6b0   : > { %v1469_v6 = vmul.f32 %v1467_v2, %v1435_v42 }
 0x6b2   : > { %v1474_v8 = vmul.f32 %v2000_v17, %v1469_v6 }
 0x6b4   : > { %v1479_v11 = vadd.f32 %v2001_v3, %v1474_v8 }
 0x6b6   : > { %v1480_v12 = vpack.c.bf16 %v1479_v11, %v1478_v10 }
 0x6b8   : > { %1887 = vmatmul.msk.bf16.vlgmr.msra.gmra.mxu1 %vm770_vm1, %v1480_v12 }
 0x735   : > { %v1513_v23 = vpop.f32.mrf.mxu1 }
 0x736   : > { %v1514_v24 = vadd.f32 %v2002_v21, %v1513_v23 }
 0x738   : > { %v1518_v25 = vmul.f32 %v1514_v24, %v1514_v24 }
 0x73a   : > { %v1520_v26 = vmul.f32 %v1518_v25, %v1514_v24 }
 0x73c   : > { %v1522_v27 = vmul.f32 0.044715, %v1520_v26 }
 0x73d   : > { %v1515_v28 = vpop.f32.mrf.mxu1 }
 0x73e   : > { %v1524_v29 = vadd.f32 %v1522_v27, %v1514_v24  ;;  %v1516_v30 = vadd.f32 %v2002_v21, %v1515_v28 }
 0x740   : > { %v1526_v32 = vmul.f32 0.7978846, %v1524_v29  ;;  %v1519_v33 = vmul.f32 %v1516_v30, %v1516_v30 }
 0x742   : > { %v1521_v34 = vmul.f32 %v1519_v33, %v1516_v30  ;;  %2046 = vtanh.f32 %v1526_v32 }
 0x744   : > { %v1523_v36 = vmul.f32 0.044715, %v1521_v34 }
 0x746   : > { %v1525_v37 = vadd.f32 %v1523_v36, %v1516_v30 }
 0x748   : > { %v1527_v7 = vmul.f32 0.7978846, %v1525_v37  ;;  %v2047_v38 = vpop.eup %2046 }
 0x749   : > { %v1530_v39 = vadd.f32 1.0, %v2047_v38 }
 0x74a   : > { %2048 = vtanh.f32 %v1527_v7 }
 0x74b   : > { %v1532_v41 = vmul.f32 0.5, %v1530_v39 }
 0x74d   : > { %v1534_v43 = vmul.f32 %v1532_v41, %v1514_v24 }
 0x750   : > { %v2049_v40 = vpop.eup %2048 }
 0x751   : > { %v1531_v9 = vadd.f32 1.0, %v2049_v40 }
 0x753   : > { %v1533_v42 = vmul.f32 0.5, %v1531_v9 }
 0x755   : > { %v1535_v44 = vmul.f32 %v1533_v42, %v1516_v30 }
 0x757   : > { %v1536_v45 = vpack.c.bf16 %v1535_v44, %v1534_v43 }
 0x759   : > { %1613 = vmatmul.bf16.vlgmr.msrb.gmra.mxu2 %v1536_v45 }
 0x7dc   : > { %v1614_v47 = vpop.f32.mrf.mxu2 }
 0x7dd   : > { %v1615_v48 = vadd.f32 %v2003_v46, %v1614_v47 }
 0x7df   : > { %v1619_v49 = vadd.f32 %v1615_v48, %v2460_v31 }
 0x7e1   : > { %1621 = vst.msk [vmem:[#allocation2] sm:$0xff] %vm770_vm1, %v1619_v49 }
 0x7e4   : > { %v1616_v50 = vpop.f32.mrf.mxu2 }
 0x7e5   : > { %v1617_v51 = vadd.f32 %v2003_v46, %v1616_v50  ;;  %1626 = sbr.rel (%p1920_p6) target bundleno = 2034 (0x7f2), region = 92 }
 0x7e7   : > { %v1620_v52 = vadd.f32 %v1617_v51, %v2465_v35 }
 0x7e9   : > { %1622 = vst.msk [vmem:[#allocation2 + $0x8] sm:$0xff] %vm770_vm1, %v1620_v52 }
 0x7ea   : > { %v1627_v53 = vld [vmem:[#allocation2] sm:$0xff] }
 0x7eb   : > { %1629 = vst.msk [vmem:[#allocation3] sm:$0xff] %vm770_vm1, %v1627_v53 }
 0x7f0   : > { %v1628_v54 = vld [vmem:[#allocation2 + $0x8] sm:$0xff] }
 0x7f1   : > { %1630 = vst.msk [vmem:[#allocation3 + $0x8] sm:$0xff] %vm770_vm1, %v1628_v54 }
 0x7f2 PF: > { %s2571_s26 = sld [smem:[#allocation7_spill]]  ;;  %s2121_s27 = smov [#allocation3]  }
 0x7f3   : > { %s2573_s0 = sld [smem:[#allocation15_spill]]  ;;  %s1639_s28 = sshll.u32 %s2121_s27, 4  ;;  %s1640_s28 = int_to_ptr.vmem [resolvable:$true] %s1639_s28 }
 0x7f4   : > { %s2122_s21 = smov 128  }
 0x7f8   : > { %s2572_s19 = sadd.s32 4294967295, %s2571_s26  }
 0x7f9   : > { %p1951_p7 = scmp.eq.s32.totalorder %s2572_s19, 1  ;;  %s1641_s18 = sshll.u32 %s2573_s0, 4  ;;  %s1642_s18 = int_to_ptr.hbm [resolvable:$true] %s1641_s18 }
 0x7fb   : > { %1948 = dma.vmem_to_hbm [thread:$0]  (%p1951_p7), %s1640_s28, 256, %s1642_s18, [#allocation4], %s2122_s21, %s2122_s21, %s2119_s17  }
 0x7fc   : > { %2091 = dma.done.wait (%p1951_p7), [#allocation4], 256  }
 0x7fd   : > { %2093 = vsyncadd (%p1951_p7), [#allocation4], 4294967040 }
 0x7fe PF: > { %s2574_s16 = sld [smem:[#allocation7_spill]] }
 0x7ff   : > { %s2575_s21 = sld [smem:[#allocation6_spill]] }
 0x800   : > { %s2576_s22 = sld [smem:[#allocation8_spill]] }
 0x804   : > { %s27_s23 = sadd.s32 1, %s2574_s16  }
 0x805   : > { %p24_p8 = scmp.ge.s32.totalorder %s27_s23, 4  }
 0x807   :  { %26 = sbr.rel (!%p24_p8) target bundleno = 9 (0x9), region = 159 }
 0x80c   :  { %1658 = vsyncpa [#allocation4], 1 }
 0x80d   :  { %1660 = vsyncpa [#allocation4 + $0x1], 1 }

</bundles_post_ra>
